<compile_context>
chip_gen: v7x
topology: tpu7x:2x2x1
jax: 0.10.0
libtpu: 0.0.40
codegen_flags: <defaults>
</compile_context>

<pallas_src>
import functools

import jax
import jax.numpy as jnp
from jax import lax
from jax.experimental import pallas as pl
from jax.experimental.pallas import tpu as pltpu


# ----------------------------- hyper params ---------------------------------
B = 2            # batch
C = 4            # input channels
H = W = 16       # spatial
FEAT = 32        # encoder feat_size == predict_q hidden == queue out_dim
NUM_CLASSES = 10
NC_PAD = 128     # class head padded to a full lane width (unmasked stores)
QK_ROWS = 8      # stacked [q; k; pad] slab padded to one sublane tile
K_QUEUE = 8192   # memory-bank length (small stand-in for the real 65536)
TK = 4096        # queue tile along K (use 4096-8192 at the real K=65536)
M_MOMENTUM = 0.999
TEMP = 0.07
BN_EPS = 1e-5
NORM_EPS = 1e-12

assert K_QUEUE % B == 0            # circular enqueue relies on this (PyTorch asserts)
assert K_QUEUE % TK == 0 and K_QUEUE // TK >= 2
assert 2 * B <= QK_ROWS


# ------------------------------- kernel --------------------------------------
def isd_fused_kernel(x_ref,
                     w_enc_ref, b_enc_ref, w_cls_ref, b_cls_ref,
                     w1_ref, gamma_ref, beta_ref, w2_ref, b2_ref,
                     queue_ref,
                     res_ref, qk_ref, sim_ref,
                     qk_bf16, *, inv_t):
    """Fused ISD forward.

    Grid: one step per (FEAT, TK) queue tile.  Step 0 additionally runs both
    encoder branches + predict_q + L2-norm and parks the stacked bf16 q/k
    slab in a persistent VMEM scratch; every step does one MXU matmul against
    the streamed queue tile.

    x_ref:     (2B, C, H*W)   rows [0:B] = query image, [B:2B] = shuffled key
    w_enc_ref: (C, 2*FEAT)    [W_enc_q | W_enc_k]   (stacked encoder GEMM)
    queue_ref: (FEAT, TK)     bf16, lane-dense in K
    res_ref:   (B, NC_PAD)    padded class logits (query branch)
    qk_ref:    (QK_ROWS, FEAT) rows [0:B]=q_n, [B:2B]=k_n (shuffled order), rest 0
    sim_ref:   (QK_ROWS, TK)  similarity tile / T
    """
    @pl.when(pl.program_id(0) == 0)
    def _():
        # global average pool over the spatial (lane) axis, both images at once
        pooled = jnp.mean(x_ref[...], axis=-1)                        # (2B, C)

        # ---- stacked encoder GEMM: one MXU push for both branches ----
        act = jnp.maximum(
            jnp.dot(pooled, w_enc_ref[...],
                    preferred_element_type=jnp.float32) + b_enc_ref[...], 0.0)
        feat_q = act[:B, :FEAT]          # query rows, query-encoder half
        feat_k = act[B:, FEAT:]          # key rows, key-encoder half

        # ---- query class head (padded to NC_PAD lanes) ----
        res_ref[...] = (jnp.dot(feat_q, w_cls_ref[...],
                                preferred_element_type=jnp.float32)
                        + b_cls_ref[...])

        # ---- predict_q: Linear(no bias) -> BatchNorm1d(batch stats) -> ReLU
        #      -> Linear(bias) ----
        h = jnp.dot(feat_q, w1_ref[...], preferred_element_type=jnp.float32)
        mean = jnp.mean(h, axis=0, keepdims=True)
        d = h - mean
        var = jnp.mean(d * d, axis=0, keepdims=True)                  # biased
        hn = d * lax.rsqrt(var + BN_EPS) * gamma_ref[...] + beta_ref[...]
        q = (jnp.dot(jnp.maximum(hn, 0.0), w2_ref[...],
                     preferred_element_type=jnp.float32) + b2_ref[...])

        # ---- L2 normalize q and k (dim=1) ----
        q_norm = jnp.sqrt(jnp.sum(q * q, axis=1, keepdims=True))
        q_n = q / jnp.maximum(q_norm, NORM_EPS)
        k_norm = jnp.sqrt(jnp.sum(feat_k * feat_k, axis=1, keepdims=True))
        k_n = feat_k / jnp.maximum(k_norm, NORM_EPS)

        # stacked slab padded to one sublane tile -> one unmasked store
        qk = jnp.concatenate(
            [q_n, k_n, jnp.zeros((QK_ROWS - 2 * B, FEAT), jnp.float32)], axis=0)
        qk_ref[...] = qk
        qk_bf16[...] = qk.astype(jnp.bfloat16)     # persists across grid steps

    # ---- every step: one matmul against the streamed (FEAT, TK) queue tile.
    # Contraction on qk's lane axis / queue's sublane axis (natural MXU weight
    # orientation), bf16 inputs with f32 accumulation.
    sim_ref[...] = jnp.dot(qk_bf16[...], queue_ref[...],
                           preferred_element_type=jnp.float32) * inv_t


# ------------------------------ pallas wrapper --------------------------------
def _const_spec(shape):
    return pl.BlockSpec(shape, lambda i, _n=len(shape): (0,) * _n)


def fused_forward(x_all, w_enc_all, b_enc_all, w_cls, b_cls,
                  w1, gamma, beta, w2, b2, queue_t):
    n_k = queue_t.shape[1]
    tk = min(TK, n_k)
    kernel = functools.partial(isd_fused_kernel, inv_t=1.0 / TEMP)
    return pl.pallas_call(
        kernel,
        out_shape=(jax.ShapeDtypeStruct((B, NC_PAD), jnp.float32),
                   jax.ShapeDtypeStruct((QK_ROWS, FEAT), jnp.float32),
                   jax.ShapeDtypeStruct((QK_ROWS, n_k), jnp.float32)),
        grid=(n_k // tk,),
        in_specs=[
            _const_spec((2 * B, C, H * W)),
            _const_spec((C, 2 * FEAT)),
            _const_spec((1, 2 * FEAT)),
            _const_spec((FEAT, NC_PAD)),
            _const_spec((1, NC_PAD)),
            _const_spec((FEAT, FEAT)),
            _const_spec((1, FEAT)),
            _const_spec((1, FEAT)),
            _const_spec((FEAT, FEAT)),
            _const_spec((1, FEAT)),
            pl.BlockSpec((FEAT, tk), lambda i: (0, i)),     # streamed queue tile
        ],
        out_specs=(
            pl.BlockSpec((B, NC_PAD), lambda i: (0, 0)),    # resident across steps
            pl.BlockSpec((QK_ROWS, FEAT), lambda i: (0, 0)),
            pl.BlockSpec((QK_ROWS, tk), lambda i: (0, i)),
        ),
        scratch_shapes=[pltpu.VMEM((QK_ROWS, FEAT), jnp.bfloat16)],
        compiler_params=pltpu.CompilerParams(
            # steps > 0 read the step-0 scratch -> must be sequential
            # (kernel is HBM-stream bound, so no loss on v7x megacore).
            dimension_semantics=("arbitrary",),
            vmem_limit_bytes=32 * 1024 * 1024),
    )(x_all, w_enc_all, b_enc_all, w_cls, b_cls,
      w1, gamma, beta, w2, b2, queue_t)


# ------------------------------ parameter init -------------------------------
def init_encoder_params(key):
    k1, k2, k3, k4 = jax.random.split(key, 4)
    # class head is stored lane-padded to NC_PAD; only the first NUM_CLASSES
    # columns are non-zero, the wrapper slices them back out.
    w_cls = jnp.zeros((FEAT, NC_PAD), jnp.float32).at[:, :NUM_CLASSES].set(
        0.1 * jax.random.normal(k3, (FEAT, NUM_CLASSES), jnp.float32))
    b_cls = jnp.zeros((1, NC_PAD), jnp.float32).at[:, :NUM_CLASSES].set(
        0.1 * jax.random.normal(k4, (1, NUM_CLASSES), jnp.float32))
    return {
        "w_enc": 0.1 * jax.random.normal(k1, (C, FEAT), jnp.float32),
        "b_enc": 0.1 * jax.random.normal(k2, (1, FEAT), jnp.float32),
        "w_cls": w_cls,
        "b_cls": b_cls,
    }


def init_predict_params(key):
    k1, k2, k3 = jax.random.split(key, 3)
    return {
        "w1": 0.1 * jax.random.normal(k1, (FEAT, FEAT), jnp.float32),
        "gamma": jnp.ones((1, FEAT), jnp.float32),
        "beta": jnp.zeros((1, FEAT), jnp.float32),
        "w2": 0.1 * jax.random.normal(k2, (FEAT, FEAT), jnp.float32),
        "b2": 0.1 * jax.random.normal(k3, (1, FEAT), jnp.float32),
    }


def init_queue_t(key):
    # PyTorch: queue (K, out_dim) = randn, F.normalize(dim=0) -> each column
    # normalized over K.  We store the bank TRANSPOSED (FEAT, K) in bf16.
    q = jax.random.normal(key, (K_QUEUE, FEAT), jnp.float32)
    norm = jnp.sqrt(jnp.sum(q * q, axis=0, keepdims=True))
    q = q / jnp.maximum(norm, NORM_EPS)
    return q.T.astype(jnp.bfloat16)


# --------------------------------- ISD forward --------------------------------
def isd_forward(im_q, im_k, enc_q_params, enc_k_params, pred_params,
                queue_t, queue_ptr, shuffle_key):
    # momentum update of the key encoder (no-grad side effect; plain-JAX glue)
    enc_k_params = jax.tree_util.tree_map(
        lambda pk, pq: pk * M_MOMENTUM + pq * (1.0 - M_MOMENTUM),
        enc_k_params, enc_q_params)

    # ShuffleBN: permute the key batch before the encoder, un-permute after
    shuffle_ids = jax.random.permutation(shuffle_key, B)
    reverse_ids = jnp.argsort(shuffle_ids)
    im_k_shuf = im_k[shuffle_ids]

    # stacked inputs / stacked encoder weights for the single fused kernel
    x_all = jnp.concatenate([im_q, im_k_shuf], axis=0).reshape(2 * B, C, H * W)
    w_enc_all = jnp.concatenate(
        [enc_q_params["w_enc"], enc_k_params["w_enc"]], axis=1)   # (C, 2F)
    b_enc_all = jnp.concatenate(
        [enc_q_params["b_enc"], enc_k_params["b_enc"]], axis=1)   # (1, 2F)

    res_pad, qk, sim = fused_forward(
        x_all, w_enc_all, b_enc_all,
        enc_q_params["w_cls"], enc_q_params["b_cls"],
        pred_params["w1"], pred_params["gamma"], pred_params["beta"],
        pred_params["w2"], pred_params["b2"],
        queue_t)

    res = res_pad[:, :NUM_CLASSES]
    k = qk[B:2 * B][reverse_ids]              # un-shuffle keys (tiny glue)
    sim_q = sim[:B]
    sim_k = sim[B:2 * B][reverse_ids]         # rows permute == un-shuffled mm

    # dequeue / enqueue (buffer side effect in PyTorch; in-place via donation)
    # queue stored transposed -> write B columns at the pointer.
    new_queue_t = lax.dynamic_update_slice(
        queue_t, k.T.astype(queue_t.dtype), (0, queue_ptr))
    new_ptr = (queue_ptr + B) % K_QUEUE

    return res, sim_q, sim_k, enc_k_params, new_queue_t, new_ptr


# donate the memory bank so the enqueue updates it in place (no full copy)
isd_forward_jit = jax.jit(isd_forward, donate_argnums=(5,))


# ------------------------------------ main ------------------------------------
if __name__ == "__main__":
    root = jax.random.PRNGKey(0)
    k_enc, k_pred, k_queue, k_imq, k_imk, k_shuf = jax.random.split(root, 6)

    enc_q_params = init_encoder_params(k_enc)
    enc_k_params = jax.tree_util.tree_map(jnp.copy, enc_q_params)  # copy_
    pred_params = init_predict_params(k_pred)
    queue_t = init_queue_t(k_queue)
    queue_ptr = jnp.int32(0)

    im_q = jax.random.normal(k_imq, (B, C, H, W), jnp.float32)
    im_k = jax.random.normal(k_imk, (B, C, H, W), jnp.float32)

    res, sim_q, sim_k, enc_k_params, queue_t, queue_ptr = isd_forward_jit(
        im_q, im_k, enc_q_params, enc_k_params, pred_params,
        queue_t, queue_ptr, k_shuf)

    jax.block_until_ready((res, sim_q, sim_k, queue_t))

    assert res.shape == (B, NUM_CLASSES)
    assert sim_q.shape == (B, K_QUEUE)
    assert sim_k.shape == (B, K_QUEUE)
    assert queue_t.shape == (FEAT, K_QUEUE)
    assert bool(jnp.isfinite(res).all())
    assert bool(jnp.isfinite(sim_q).all()) and bool(jnp.isfinite(sim_k).all())

    print("KERNEL_OK")
</pallas_src>

<mosaic_0001>
module attributes {stable_mosaic.version = 11 : i64} {
  func.func @isd_fused_kernel(%arg0: i32, %arg1: memref<4x4x256xf32, #tpu.memory_space<vmem>>, %arg2: memref<4x64xf32, #tpu.memory_space<vmem>>, %arg3: memref<1x64xf32, #tpu.memory_space<vmem>>, %arg4: memref<32x128xf32, #tpu.memory_space<vmem>>, %arg5: memref<1x128xf32, #tpu.memory_space<vmem>>, %arg6: memref<32x32xf32, #tpu.memory_space<vmem>>, %arg7: memref<1x32xf32, #tpu.memory_space<vmem>>, %arg8: memref<1x32xf32, #tpu.memory_space<vmem>>, %arg9: memref<32x32xf32, #tpu.memory_space<vmem>>, %arg10: memref<1x32xf32, #tpu.memory_space<vmem>>, %arg11: memref<32x4096xbf16, #tpu.memory_space<vmem>>, %arg12: memref<2x128xf32, #tpu.memory_space<vmem>>, %arg13: memref<8x32xf32, #tpu.memory_space<vmem>>, %arg14: memref<8x4096xf32, #tpu.memory_space<vmem>>, %arg15: memref<8x32xbf16, #tpu.memory_space<vmem>>) attributes {dimension_semantics = [#tpu.dimension_semantics<arbitrary>], iteration_bounds = array<i64: 2>, scalar_prefetch = 0 : i64, scratch_operands = 1 : i64, tpu.core_type = #tpu.core_type<tc>, window_params = [{pipeline_mode = #tpu.pipeline_mode<synchronous>, transform_indices = @transform_0, window_bounds = array<i64: 4, 4, 256>}, {pipeline_mode = #tpu.pipeline_mode<synchronous>, transform_indices = @transform_1, window_bounds = array<i64: 4, 64>}, {pipeline_mode = #tpu.pipeline_mode<synchronous>, transform_indices = @transform_2, window_bounds = array<i64: 1, 64>}, {pipeline_mode = #tpu.pipeline_mode<synchronous>, transform_indices = @transform_3, window_bounds = array<i64: 32, 128>}, {pipeline_mode = #tpu.pipeline_mode<synchronous>, transform_indices = @transform_4, window_bounds = array<i64: 1, 128>}, {pipeline_mode = #tpu.pipeline_mode<synchronous>, transform_indices = @transform_5, window_bounds = array<i64: 32, 32>}, {pipeline_mode = #tpu.pipeline_mode<synchronous>, transform_indices = @transform_6, window_bounds = array<i64: 1, 32>}, {pipeline_mode = #tpu.pipeline_mode<synchronous>, transform_indices = @transform_7, window_bounds = array<i64: 1, 32>}, {pipeline_mode = #tpu.pipeline_mode<synchronous>, transform_indices = @transform_8, window_bounds = array<i64: 32, 32>}, {pipeline_mode = #tpu.pipeline_mode<synchronous>, transform_indices = @transform_9, window_bounds = array<i64: 1, 32>}, {transform_indices = @transform_10, window_bounds = array<i64: 32, 4096>}, {pipeline_mode = #tpu.pipeline_mode<synchronous>, transform_indices = @transform_11, window_bounds = array<i64: 2, 128>}, {pipeline_mode = #tpu.pipeline_mode<synchronous>, transform_indices = @transform_12, window_bounds = array<i64: 8, 32>}, {transform_indices = @transform_13, window_bounds = array<i64: 8, 4096>}]} {
    %c0_i32 = arith.constant 0 : i32
    %0 = arith.cmpi eq, %arg0, %c0_i32 : i32
    %1 = arith.extui %0 : i1 to i32
    %c0_i32_0 = arith.constant 0 : i32
    %2 = arith.cmpi ne, %1, %c0_i32_0 : i32
    scf.if %2 {
      %c0_7 = arith.constant 0 : index
      %c0_8 = arith.constant 0 : index
      %c0_9 = arith.constant 0 : index
      %9 = vector.load %arg1[%c0_7, %c0_8, %c0_9] : memref<4x4x256xf32, #tpu.memory_space<vmem>>, vector<4x4x256xf32>
      %cst_10 = arith.constant dense<0.000000e+00> : vector<4x4xf32>
      %10 = vector.multi_reduction <add>, %9, %cst_10 [2] : vector<4x4x256xf32> to vector<4x4xf32>
      %cst_11 = arith.constant 2.560000e+02 : f32
      %11 = vector.broadcast %cst_11 : f32 to vector<4x4xf32>
      %12 = arith.divf %10, %11 : vector<4x4xf32>
      %c0_12 = arith.constant 0 : index
      %c0_13 = arith.constant 0 : index
      %13 = vector.load %arg2[%c0_12, %c0_13] : memref<4x64xf32, #tpu.memory_space<vmem>>, vector<4x64xf32>
      %cst_14 = arith.constant dense<0.000000e+00> : vector<4x64xf32>
      %14 = tpu.matmul %12, %13, %cst_14 {dimension_numbers = #tpu.dot_dimension_numbers<[1], [0], [0], [1], [0, 0, 1, 1], [], []>} : vector<4x4xf32>, vector<4x64xf32>, vector<4x64xf32> -> vector<4x64xf32>
      %c0_15 = arith.constant 0 : index
      %c0_16 = arith.constant 0 : index
      %15 = vector.load %arg3[%c0_15, %c0_16] : memref<1x64xf32, #tpu.memory_space<vmem>>, vector<1x64xf32>
      %16 = vector.broadcast %15 : vector<1x64xf32> to vector<4x64xf32>
      %17 = arith.addf %14, %16 : vector<4x64xf32>
      %cst_17 = arith.constant 0.000000e+00 : f32
      %18 = vector.broadcast %cst_17 : f32 to vector<4x64xf32>
      %19 = arith.maximumf %17, %18 : vector<4x64xf32>
      %20 = vector.extract_strided_slice %19 {offsets = [0, 0], sizes = [2, 32], strides = [1, 1]} : vector<4x64xf32> to vector<2x32xf32>
      %21 = vector.extract_strided_slice %19 {offsets = [2, 32], sizes = [2, 32], strides = [1, 1]} : vector<4x64xf32> to vector<2x32xf32>
      %c0_18 = arith.constant 0 : index
      %c0_19 = arith.constant 0 : index
      %22 = vector.load %arg4[%c0_18, %c0_19] : memref<32x128xf32, #tpu.memory_space<vmem>>, vector<32x128xf32>
      %cst_20 = arith.constant dense<0.000000e+00> : vector<2x128xf32>
      %23 = tpu.matmul %20, %22, %cst_20 {dimension_numbers = #tpu.dot_dimension_numbers<[1], [0], [0], [1], [0, 0, 1, 1], [], []>} : vector<2x32xf32>, vector<32x128xf32>, vector<2x128xf32> -> vector<2x128xf32>
      %c0_21 = arith.constant 0 : index
      %c0_22 = arith.constant 0 : index
      %24 = vector.load %arg5[%c0_21, %c0_22] : memref<1x128xf32, #tpu.memory_space<vmem>>, vector<1x128xf32>
      %25 = vector.broadcast %24 : vector<1x128xf32> to vector<2x128xf32>
      %26 = arith.addf %23, %25 : vector<2x128xf32>
      %c0_23 = arith.constant 0 : index
      %c0_24 = arith.constant 0 : index
      %27 = vector.load %arg12[%c0_23, %c0_24] : memref<2x128xf32, #tpu.memory_space<vmem>>, vector<2x128xf32>
      tpu.vector_store %arg12[%c0_23, %c0_24], %26 {strides = array<i32>} : memref<2x128xf32, #tpu.memory_space<vmem>>, vector<2x128xf32>,
      %c0_25 = arith.constant 0 : index
      %c0_26 = arith.constant 0 : index
      %28 = vector.load %arg6[%c0_25, %c0_26] : memref<32x32xf32, #tpu.memory_space<vmem>>, vector<32x32xf32>
      %cst_27 = arith.constant dense<0.000000e+00> : vector<2x32xf32>
      %29 = tpu.matmul %20, %28, %cst_27 {dimension_numbers = #tpu.dot_dimension_numbers<[1], [0], [0], [1], [0, 0, 1, 1], [], []>} : vector<2x32xf32>, vector<32x32xf32>, vector<2x32xf32> -> vector<2x32xf32>
      %cst_28 = arith.constant dense<0.000000e+00> : vector<32xf32>
      %30 = vector.multi_reduction <add>, %29, %cst_28 [0] : vector<2x32xf32> to vector<32xf32>
      %31 = vector.shape_cast %30 : vector<32xf32> to vector<1x32xf32>
      %cst_29 = arith.constant 2.000000e+00 : f32
      %32 = vector.broadcast %cst_29 : f32 to vector<1x32xf32>
      %33 = arith.divf %31, %32 : vector<1x32xf32>
      %34 = vector.broadcast %33 : vector<1x32xf32> to vector<2x32xf32>
      %35 = arith.subf %29, %34 : vector<2x32xf32>
      %36 = arith.mulf %35, %35 : vector<2x32xf32>
      %cst_30 = arith.constant dense<0.000000e+00> : vector<32xf32>
      %37 = vector.multi_reduction <add>, %36, %cst_30 [0] : vector<2x32xf32> to vector<32xf32>
      %38 = vector.shape_cast %37 : vector<32xf32> to vector<1x32xf32>
      %cst_31 = arith.constant 2.000000e+00 : f32
      %39 = vector.broadcast %cst_31 : f32 to vector<1x32xf32>
      %40 = arith.divf %38, %39 : vector<1x32xf32>
      %cst_32 = arith.constant 9.99999974E-6 : f32
      %41 = vector.broadcast %cst_32 : f32 to vector<1x32xf32>
      %42 = arith.addf %40, %41 : vector<1x32xf32>
      %43 = math.rsqrt %42 : vector<1x32xf32>
      %44 = vector.broadcast %43 : vector<1x32xf32> to vector<2x32xf32>
      %45 = arith.mulf %35, %44 : vector<2x32xf32>
      %c0_33 = arith.constant 0 : index
      %c0_34 = arith.constant 0 : index
      %46 = vector.load %arg7[%c0_33, %c0_34] : memref<1x32xf32, #tpu.memory_space<vmem>>, vector<1x32xf32>
      %47 = vector.broadcast %46 : vector<1x32xf32> to vector<2x32xf32>
      %48 = arith.mulf %45, %47 : vector<2x32xf32>
      %c0_35 = arith.constant 0 : index
      %c0_36 = arith.constant 0 : index
      %49 = vector.load %arg8[%c0_35, %c0_36] : memref<1x32xf32, #tpu.memory_space<vmem>>, vector<1x32xf32>
      %50 = vector.broadcast %49 : vector<1x32xf32> to vector<2x32xf32>
      %51 = arith.addf %48, %50 : vector<2x32xf32>
      %cst_37 = arith.constant 0.000000e+00 : f32
      %52 = vector.broadcast %cst_37 : f32 to vector<2x32xf32>
      %53 = arith.maximumf %51, %52 : vector<2x32xf32>
      %c0_38 = arith.constant 0 : index
      %c0_39 = arith.constant 0 : index
      %54 = vector.load %arg9[%c0_38, %c0_39] : memref<32x32xf32, #tpu.memory_space<vmem>>, vector<32x32xf32>
      %cst_40 = arith.constant dense<0.000000e+00> : vector<2x32xf32>
      %55 = tpu.matmul %53, %54, %cst_40 {dimension_numbers = #tpu.dot_dimension_numbers<[1], [0], [0], [1], [0, 0, 1, 1], [], []>} : vector<2x32xf32>, vector<32x32xf32>, vector<2x32xf32> -> vector<2x32xf32>
      %c0_41 = arith.constant 0 : index
      %c0_42 = arith.constant 0 : index
      %56 = vector.load %arg10[%c0_41, %c0_42] : memref<1x32xf32, #tpu.memory_space<vmem>>, vector<1x32xf32>
      %57 = vector.broadcast %56 : vector<1x32xf32> to vector<2x32xf32>
      %58 = arith.addf %55, %57 : vector<2x32xf32>
      %59 = arith.mulf %58, %58 : vector<2x32xf32>
      %cst_43 = arith.constant dense<0.000000e+00> : vector<2xf32>
      %60 = vector.multi_reduction <add>, %59, %cst_43 [1] : vector<2x32xf32> to vector<2xf32>
      %61 = vector.shape_cast %60 : vector<2xf32> to vector<2x1xf32>
      %62 = math.sqrt %61 : vector<2x1xf32>
      %cst_44 = arith.constant 9.99999996E-13 : f32
      %63 = vector.broadcast %cst_44 : f32 to vector<2x1xf32>
      %64 = arith.maximumf %62, %63 : vector<2x1xf32>
      %65 = vector.broadcast %64 : vector<2x1xf32> to vector<2x32xf32>
      %66 = arith.divf %58, %65 : vector<2x32xf32>
      %67 = arith.mulf %21, %21 : vector<2x32xf32>
      %cst_45 = arith.constant dense<0.000000e+00> : vector<2xf32>
      %68 = vector.multi_reduction <add>, %67, %cst_45 [1] : vector<2x32xf32> to vector<2xf32>
      %69 = vector.shape_cast %68 : vector<2xf32> to vector<2x1xf32>
      %70 = math.sqrt %69 : vector<2x1xf32>
      %cst_46 = arith.constant 9.99999996E-13 : f32
      %71 = vector.broadcast %cst_46 : f32 to vector<2x1xf32>
      %72 = arith.maximumf %70, %71 : vector<2x1xf32>
      %73 = vector.broadcast %72 : vector<2x1xf32> to vector<2x32xf32>
      %74 = arith.divf %21, %73 : vector<2x32xf32>
      %cst_47 = arith.constant 0.000000e+00 : f32
      %75 = vector.broadcast %cst_47 : f32 to vector<4x32xf32>
      %76 = tpu.concatenate %66, %74, %75 in 0 : vector<2x32xf32>, vector<2x32xf32>, vector<4x32xf32> -> vector<8x32xf32>
      %c0_48 = arith.constant 0 : index
      %c0_49 = arith.constant 0 : index
      %77 = vector.load %arg13[%c0_48, %c0_49] : memref<8x32xf32, #tpu.memory_space<vmem>>, vector<8x32xf32>
      tpu.vector_store %arg13[%c0_48, %c0_49], %76 {strides = array<i32>} : memref<8x32xf32, #tpu.memory_space<vmem>>, vector<8x32xf32>,
      %78 = arith.truncf %76 : vector<8x32xf32> to vector<8x32xbf16>
      %c0_50 = arith.constant 0 : index
      %c0_51 = arith.constant 0 : index
      %79 = vector.load %arg15[%c0_50, %c0_51] : memref<8x32xbf16, #tpu.memory_space<vmem>>, vector<8x32xbf16>
      tpu.vector_store %arg15[%c0_50, %c0_51], %78 {strides = array<i32>} : memref<8x32xbf16, #tpu.memory_space<vmem>>, vector<8x32xbf16>,
    } else {
    }
    %c0 = arith.constant 0 : index
    %c0_1 = arith.constant 0 : index
    %3 = vector.load %arg15[%c0, %c0_1] : memref<8x32xbf16, #tpu.memory_space<vmem>>, vector<8x32xbf16>
    %c0_2 = arith.constant 0 : index
    %c0_3 = arith.constant 0 : index
    %4 = vector.load %arg11[%c0_2, %c0_3] : memref<32x4096xbf16, #tpu.memory_space<vmem>>, vector<32x4096xbf16>
    %cst = arith.constant dense<0.000000e+00> : vector<8x4096xf32>
    %5 = tpu.matmul %3, %4, %cst {dimension_numbers = #tpu.dot_dimension_numbers<[1], [0], [0], [1], [0, 0, 1, 1], [], []>} : vector<8x32xbf16>, vector<32x4096xbf16>, vector<8x4096xf32> -> vector<8x4096xf32>
    %cst_4 = arith.constant 14.2857141 : f32
    %6 = vector.broadcast %cst_4 : f32 to vector<8x4096xf32>
    %7 = arith.mulf %5, %6 : vector<8x4096xf32>
    %c0_5 = arith.constant 0 : index
    %c0_6 = arith.constant 0 : index
    %8 = vector.load %arg14[%c0_5, %c0_6] : memref<8x4096xf32, #tpu.memory_space<vmem>>, vector<8x4096xf32>
    tpu.vector_store %arg14[%c0_5, %c0_6], %7 {strides = array<i32>} : memref<8x4096xf32, #tpu.memory_space<vmem>>, vector<8x4096xf32>,
    return
  }
  func.func @transform_0(%arg0: i32) -> (i32, i32, i32) {
    %c0_i32 = arith.constant 0 : i32
    %c0_i32_0 = arith.constant 0 : i32
    %c0_i32_1 = arith.constant 0 : i32
    %c0_i32_2 = arith.constant 0 : i32
    return %c0_i32, %c0_i32_0, %c0_i32_1 : i32, i32, i32
  }
  func.func @transform_1(%arg0: i32) -> (i32, i32) {
    %c0_i32 = arith.constant 0 : i32
    %c0_i32_0 = arith.constant 0 : i32
    %c0_i32_1 = arith.constant 0 : i32
    return %c0_i32, %c0_i32_0 : i32, i32
  }
  func.func @transform_2(%arg0: i32) -> (i32, i32) {
    %c0_i32 = arith.constant 0 : i32
    %c0_i32_0 = arith.constant 0 : i32
    %c0_i32_1 = arith.constant 0 : i32
    return %c0_i32, %c0_i32_0 : i32, i32
  }
  func.func @transform_3(%arg0: i32) -> (i32, i32) {
    %c0_i32 = arith.constant 0 : i32
    %c0_i32_0 = arith.constant 0 : i32
    %c0_i32_1 = arith.constant 0 : i32
    return %c0_i32, %c0_i32_0 : i32, i32
  }
  func.func @transform_4(%arg0: i32) -> (i32, i32) {
    %c0_i32 = arith.constant 0 : i32
    %c0_i32_0 = arith.constant 0 : i32
    %c0_i32_1 = arith.constant 0 : i32
    return %c0_i32, %c0_i32_0 : i32, i32
  }
  func.func @transform_5(%arg0: i32) -> (i32, i32) {
    %c0_i32 = arith.constant 0 : i32
    %c0_i32_0 = arith.constant 0 : i32
    %c0_i32_1 = arith.constant 0 : i32
    return %c0_i32, %c0_i32_0 : i32, i32
  }
  func.func @transform_6(%arg0: i32) -> (i32, i32) {
    %c0_i32 = arith.constant 0 : i32
    %c0_i32_0 = arith.constant 0 : i32
    %c0_i32_1 = arith.constant 0 : i32
    return %c0_i32, %c0_i32_0 : i32, i32
  }
  func.func @transform_7(%arg0: i32) -> (i32, i32) {
    %c0_i32 = arith.constant 0 : i32
    %c0_i32_0 = arith.constant 0 : i32
    %c0_i32_1 = arith.constant 0 : i32
    return %c0_i32, %c0_i32_0 : i32, i32
  }
  func.func @transform_8(%arg0: i32) -> (i32, i32) {
    %c0_i32 = arith.constant 0 : i32
    %c0_i32_0 = arith.constant 0 : i32
    %c0_i32_1 = arith.constant 0 : i32
    return %c0_i32, %c0_i32_0 : i32, i32
  }
  func.func @transform_9(%arg0: i32) -> (i32, i32) {
    %c0_i32 = arith.constant 0 : i32
    %c0_i32_0 = arith.constant 0 : i32
    %c0_i32_1 = arith.constant 0 : i32
    return %c0_i32, %c0_i32_0 : i32, i32
  }
  func.func @transform_10(%arg0: i32) -> (i32, i32) {
    %c0_i32 = arith.constant 0 : i32
    %c0_i32_0 = arith.constant 0 : i32
    return %c0_i32, %arg0 : i32, i32
  }
  func.func @transform_11(%arg0: i32) -> (i32, i32) {
    %c0_i32 = arith.constant 0 : i32
    %c0_i32_0 = arith.constant 0 : i32
    %c0_i32_1 = arith.constant 0 : i32
    return %c0_i32, %c0_i32_0 : i32, i32
  }
  func.func @transform_12(%arg0: i32) -> (i32, i32) {
    %c0_i32 = arith.constant 0 : i32
    %c0_i32_0 = arith.constant 0 : i32
    %c0_i32_1 = arith.constant 0 : i32
    return %c0_i32, %c0_i32_0 : i32, i32
  }
  func.func @transform_13(%arg0: i32) -> (i32, i32) {
    %c0_i32 = arith.constant 0 : i32
    %c0_i32_0 = arith.constant 0 : i32
    return %c0_i32, %arg0 : i32, i32
  }
}

</mosaic_0001>

<bundles_post_ra>
// kernel: isd_forward.1
= control target key start
LH: loop header
LB: loop body
LE: loop exit
PB: predicated region body
PF: predicated region fallthrough
CT: control target
= control target key end

     0   :  { %19 = vsyncpa [#allocation5], 0  ;;  %s2634_s25 = smov 0   ;;  %s2636_s26 = smov 0   ;;  %s3098_s0 = inlined_call_operand.vmem [shape: f32[4,4,256], index: 0, kind: input, shape index: {}]   ;;  %s3099_s1 = inlined_call_operand.vmem [shape: f32[4,64], index: 1, kind: input, shape index: {}]   ;;  %s3100_s2 = inlined_call_operand.vmem [shape: f32[1,64], index: 2, kind: input, shape index: {}]   ;;  %s3101_s3 = inlined_call_operand.vmem [shape: f32[32,128], index: 3, kind: input, shape index: {}]   ;;  %s3102_s4 = inlined_call_operand.vmem [shape: f32[1,128], index: 4, kind: input, shape index: {}]   ;;  %s3103_s5 = inlined_call_operand.vmem [shape: f32[32,32], index: 5, kind: input, shape index: {}]   ;;  %s3104_s6 = inlined_call_operand.vmem [shape: f32[1,32], index: 6, kind: input, shape index: {}]   ;;  %s3105_s7 = inlined_call_operand.vmem [shape: f32[1,32], index: 7, kind: input, shape index: {}]   ;;  %s3106_s8 = inlined_call_operand.vmem [shape: f32[32,32], index: 8, kind: input, shape index: {}]   ;;  %s3107_s9 = inlined_call_operand.vmem [shape: f32[1,32], index: 9, kind: input, shape index: {}]   ;;  %s3108_s10 = inlined_call_operand.vmem [shape: bf16[32,8192], index: 10, kind: input, shape index: {}]   ;;  %s3109_s11 = inlined_call_operand.hbm [shape: f32[2,128], index: 11, kind: output, shape index: {0}]   ;;  %s3110_s12 = inlined_call_operand.vmem [shape: f32[8,32], index: 12, kind: output, shape index: {1}]   ;;  %s3111_s13 = inlined_call_operand.vmem [shape: f32[8,8192], index: 13, kind: output, shape index: {2}]  }
   0x1   :  { %s2638_s27 = smov 0  }
   0x2 LB: > { %s2650_s28 = sadd.s32 4294967295, %s2556_s27   ;;  %s2653_s29 = sadd.s32 1, %s2556_s27   ;;  %s2556_s27 = sphi %s2638_s27, %s3114_s27   ;;  %s2552_s26 = sphi %s2636_s26, %s3113_s26   ;;  %s2548_s25 = sphi %s2634_s25, %s3112_s25  }
   0x3   : > { %s239_s30 = ssub.s32 %s2556_s27, %s2653_s29  ;;  %s242_s14 = sadd.s32 1, %s2552_s26 }
   0x4   : > { %p240_p0 = scmp.eq.s32.totalorder %s239_s30, 0  ;;  %p249_p1 = scmp.ne.s32.totalorder %s2552_s26, %s2548_s25 }
   0x5   : > { %p250_p2 = scmp.eq.s32.totalorder %s2556_s27, 0  ;;  %p2277_p4 = scmp.ge.s32.totalorder %s2556_s27, 2 }
   0x6   : > { %s2662_s15 = scalar_select %p240_p0, %s2552_s26, %s242_s14  }
   0x7   : > { %p251_p3 = por %p250_p2, %p249_p1  ;;  %373 = sbr.rel (%p2277_p4) target bundleno = 50 (0x32), region = 56 }
   0xe   : > { %376 = sbr.rel (!%p251_p3) target bundleno = 50 (0x32), region = 60  ;;  %s378_s16 = sand.u32 (%p251_p3), 1, %s2552_s26  }
   0xf   : > { %s2380_s17 = sshll.u32 (%p251_p3), %s2556_s27, 7  ;;  %s2278_s18 = sshll.u32 (%p251_p3), %s378_s16, 9 }
  0x10   : > { %s2670_s21 = scalar_lea.vmem (%p251_p3), %s3108_s10, %s2380_s17  ;;  %s2675_s22 = scalar_lea.vmem (%p251_p3), [#allocation3], %s2278_s18 }
  0x11   : > { %v396_v0 = vld [vmem:[%s2670_s21] sm:$0xff] (%p251_p3)  ;;  %v398_v1 = vld [vmem:[%s2670_s21 + $0x8] sm:$0xff] (%p251_p3)  ;;  %v400_v2 = vld [vmem:[%s2670_s21 + $0x10] sm:$0xff] (%p251_p3) }
  0x12   : > { %397 = vst [vmem:[%s2675_s22] sm:$0xff] (%p251_p3), %v396_v0  ;;  %399 = vst [vmem:[%s2675_s22 + $0x8] sm:$0xff] (%p251_p3), %v398_v1  ;;  %v402_v3 = vld [vmem:[%s2670_s21 + $0x18] sm:$0xff] (%p251_p3)  ;;  %v404_v4 = vld [vmem:[%s2670_s21 + $0x20] sm:$0xff] (%p251_p3) }
  0x13   : > { %401 = vst [vmem:[%s2675_s22 + $0x10] sm:$0xff] (%p251_p3), %v400_v2  ;;  %v406_v5 = vld [vmem:[%s2670_s21 + $0x28] sm:$0xff] (%p251_p3)  ;;  %403 = vst [vmem:[%s2675_s22 + $0x18] sm:$0xff] (%p251_p3), %v402_v3  ;;  %v408_v6 = vld [vmem:[%s2670_s21 + $0x30] sm:$0xff] (%p251_p3) }
  0x14   : > { %405 = vst [vmem:[%s2675_s22 + $0x20] sm:$0xff] (%p251_p3), %v404_v4  ;;  %407 = vst [vmem:[%s2675_s22 + $0x28] sm:$0xff] (%p251_p3), %v406_v5  ;;  %v410_v7 = vld [vmem:[%s2670_s21 + $0x38] sm:$0xff] (%p251_p3)  ;;  %v412_v8 = vld [vmem:[%s2670_s21 + $0x40] sm:$0xff] (%p251_p3) }
  0x15   : > { %409 = vst [vmem:[%s2675_s22 + $0x30] sm:$0xff] %v408_v6  ;;  %411 = vst [vmem:[%s2675_s22 + $0x38] sm:$0xff] %v410_v7  ;;  %v414_v9 = vld [vmem:[%s2670_s21 + $0x48] sm:$0xff]  ;;  %v416_v10 = vld [vmem:[%s2670_s21 + $0x50] sm:$0xff] }
  0x16   : > { %413 = vst [vmem:[%s2675_s22 + $0x40] sm:$0xff] %v412_v8  ;;  %v418_v11 = vld [vmem:[%s2670_s21 + $0x58] sm:$0xff]  ;;  %415 = vst [vmem:[%s2675_s22 + $0x48] sm:$0xff] %v414_v9  ;;  %v420_v12 = vld [vmem:[%s2670_s21 + $0x60] sm:$0xff] }
  0x17   : > { %417 = vst [vmem:[%s2675_s22 + $0x50] sm:$0xff] %v416_v10  ;;  %419 = vst [vmem:[%s2675_s22 + $0x58] sm:$0xff] %v418_v11  ;;  %v422_v13 = vld [vmem:[%s2670_s21 + $0x68] sm:$0xff]  ;;  %v424_v14 = vld [vmem:[%s2670_s21 + $0x70] sm:$0xff] }
  0x18   : > { %421 = vst [vmem:[%s2675_s22 + $0x60] sm:$0xff] %v420_v12  ;;  %423 = vst [vmem:[%s2675_s22 + $0x68] sm:$0xff] %v422_v13  ;;  %v426_v15 = vld [vmem:[%s2670_s21 + $0x78] sm:$0xff]  ;;  %v428_v16 = vld [vmem:[%s2670_s21 + $0x100] sm:$0xff] }
  0x19   : > { %425 = vst [vmem:[%s2675_s22 + $0x70] sm:$0xff] %v424_v14  ;;  %v430_v17 = vld [vmem:[%s2670_s21 + $0x108] sm:$0xff]  ;;  %427 = vst [vmem:[%s2675_s22 + $0x78] sm:$0xff] %v426_v15  ;;  %v432_v18 = vld [vmem:[%s2670_s21 + $0x110] sm:$0xff] }
  0x1a   : > { %429 = vst [vmem:[%s2675_s22 + $0x80] sm:$0xff] %v428_v16  ;;  %431 = vst [vmem:[%s2675_s22 + $0x88] sm:$0xff] %v430_v17  ;;  %v434_v19 = vld [vmem:[%s2670_s21 + $0x118] sm:$0xff]  ;;  %v436_v20 = vld [vmem:[%s2670_s21 + $0x120] sm:$0xff] }
  0x1b   : > { %433 = vst [vmem:[%s2675_s22 + $0x90] sm:$0xff] %v432_v18  ;;  %435 = vst [vmem:[%s2675_s22 + $0x98] sm:$0xff] %v434_v19  ;;  %v438_v21 = vld [vmem:[%s2670_s21 + $0x128] sm:$0xff]  ;;  %v440_v22 = vld [vmem:[%s2670_s21 + $0x130] sm:$0xff] }
  0x1c   : > { %437 = vst [vmem:[%s2675_s22 + $0xa0] sm:$0xff] %v436_v20  ;;  %v442_v23 = vld [vmem:[%s2670_s21 + $0x138] sm:$0xff]  ;;  %439 = vst [vmem:[%s2675_s22 + $0xa8] sm:$0xff] %v438_v21  ;;  %v444_v24 = vld [vmem:[%s2670_s21 + $0x140] sm:$0xff] }
  0x1d   : > { %441 = vst [vmem:[%s2675_s22 + $0xb0] sm:$0xff] %v440_v22  ;;  %443 = vst [vmem:[%s2675_s22 + $0xb8] sm:$0xff] %v442_v23  ;;  %v446_v25 = vld [vmem:[%s2670_s21 + $0x148] sm:$0xff]  ;;  %v448_v26 = vld [vmem:[%s2670_s21 + $0x150] sm:$0xff] }
  0x1e   : > { %445 = vst [vmem:[%s2675_s22 + $0xc0] sm:$0xff] %v444_v24  ;;  %447 = vst [vmem:[%s2675_s22 + $0xc8] sm:$0xff] %v446_v25  ;;  %v450_v27 = vld [vmem:[%s2670_s21 + $0x158] sm:$0xff]  ;;  %v452_v28 = vld [vmem:[%s2670_s21 + $0x160] sm:$0xff] }
  0x1f   : > { %449 = vst [vmem:[%s2675_s22 + $0xd0] sm:$0xff] %v448_v26  ;;  %v454_v29 = vld [vmem:[%s2670_s21 + $0x168] sm:$0xff]  ;;  %451 = vst [vmem:[%s2675_s22 + $0xd8] sm:$0xff] %v450_v27  ;;  %v456_v30 = vld [vmem:[%s2670_s21 + $0x170] sm:$0xff] }
  0x20   : > { %453 = vst [vmem:[%s2675_s22 + $0xe0] sm:$0xff] %v452_v28  ;;  %455 = vst [vmem:[%s2675_s22 + $0xe8] sm:$0xff] %v454_v29  ;;  %v458_v31 = vld [vmem:[%s2670_s21 + $0x178] sm:$0xff]  ;;  %v460_v32 = vld [vmem:[%s2670_s21 + $0x200] sm:$0xff] }
  0x21   : > { %457 = vst [vmem:[%s2675_s22 + $0xf0] sm:$0xff] %v456_v30  ;;  %459 = vst [vmem:[%s2675_s22 + $0xf8] sm:$0xff] %v458_v31  ;;  %v462_v33 = vld [vmem:[%s2670_s21 + $0x208] sm:$0xff]  ;;  %v464_v34 = vld [vmem:[%s2670_s21 + $0x210] sm:$0xff] }
  0x22   : > { %461 = vst [vmem:[%s2675_s22 + $0x100] sm:$0xff] %v460_v32  ;;  %v466_v35 = vld [vmem:[%s2670_s21 + $0x218] sm:$0xff]  ;;  %463 = vst [vmem:[%s2675_s22 + $0x108] sm:$0xff] %v462_v33  ;;  %v468_v36 = vld [vmem:[%s2670_s21 + $0x220] sm:$0xff] }
  0x23   : > { %465 = vst [vmem:[%s2675_s22 + $0x110] sm:$0xff] %v464_v34  ;;  %467 = vst [vmem:[%s2675_s22 + $0x118] sm:$0xff] %v466_v35  ;;  %v470_v37 = vld [vmem:[%s2670_s21 + $0x228] sm:$0xff]  ;;  %v472_v38 = vld [vmem:[%s2670_s21 + $0x230] sm:$0xff] }
  0x24   : > { %469 = vst [vmem:[%s2675_s22 + $0x120] sm:$0xff] %v468_v36  ;;  %471 = vst [vmem:[%s2675_s22 + $0x128] sm:$0xff] %v470_v37  ;;  %v474_v39 = vld [vmem:[%s2670_s21 + $0x238] sm:$0xff]  ;;  %v476_v40 = vld [vmem:[%s2670_s21 + $0x240] sm:$0xff] }
  0x25   : > { %473 = vst [vmem:[%s2675_s22 + $0x130] sm:$0xff] %v472_v38  ;;  %v478_v41 = vld [vmem:[%s2670_s21 + $0x248] sm:$0xff]  ;;  %475 = vst [vmem:[%s2675_s22 + $0x138] sm:$0xff] %v474_v39  ;;  %v480_v42 = vld [vmem:[%s2670_s21 + $0x250] sm:$0xff] }
  0x26   : > { %477 = vst [vmem:[%s2675_s22 + $0x140] sm:$0xff] %v476_v40  ;;  %479 = vst [vmem:[%s2675_s22 + $0x148] sm:$0xff] %v478_v41  ;;  %v482_v43 = vld [vmem:[%s2670_s21 + $0x258] sm:$0xff]  ;;  %v484_v44 = vld [vmem:[%s2670_s21 + $0x260] sm:$0xff] }
  0x27   : > { %481 = vst [vmem:[%s2675_s22 + $0x150] sm:$0xff] %v480_v42  ;;  %483 = vst [vmem:[%s2675_s22 + $0x158] sm:$0xff] %v482_v43  ;;  %v486_v45 = vld [vmem:[%s2670_s21 + $0x268] sm:$0xff]  ;;  %v488_v46 = vld [vmem:[%s2670_s21 + $0x270] sm:$0xff] }
  0x28   : > { %485 = vst [vmem:[%s2675_s22 + $0x160] sm:$0xff] %v484_v44  ;;  %v490_v47 = vld [vmem:[%s2670_s21 + $0x278] sm:$0xff]  ;;  %487 = vst [vmem:[%s2675_s22 + $0x168] sm:$0xff] %v486_v45  ;;  %v492_v48 = vld [vmem:[%s2670_s21 + $0x300] sm:$0xff] }
  0x29   : > { %489 = vst [vmem:[%s2675_s22 + $0x170] sm:$0xff] %v488_v46  ;;  %491 = vst [vmem:[%s2675_s22 + $0x178] sm:$0xff] %v490_v47  ;;  %v494_v49 = vld [vmem:[%s2670_s21 + $0x308] sm:$0xff]  ;;  %v496_v50 = vld [vmem:[%s2670_s21 + $0x310] sm:$0xff] }
  0x2a   : > { %493 = vst [vmem:[%s2675_s22 + $0x180] sm:$0xff] %v492_v48  ;;  %495 = vst [vmem:[%s2675_s22 + $0x188] sm:$0xff] %v494_v49  ;;  %v498_v51 = vld [vmem:[%s2670_s21 + $0x318] sm:$0xff]  ;;  %v500_v52 = vld [vmem:[%s2670_s21 + $0x320] sm:$0xff] }
  0x2b   : > { %497 = vst [vmem:[%s2675_s22 + $0x190] sm:$0xff] %v496_v50  ;;  %v502_v53 = vld [vmem:[%s2670_s21 + $0x328] sm:$0xff]  ;;  %499 = vst [vmem:[%s2675_s22 + $0x198] sm:$0xff] %v498_v51  ;;  %v504_v54 = vld [vmem:[%s2670_s21 + $0x330] sm:$0xff] }
  0x2c   : > { %501 = vst [vmem:[%s2675_s22 + $0x1a0] sm:$0xff] %v500_v52  ;;  %503 = vst [vmem:[%s2675_s22 + $0x1a8] sm:$0xff] %v502_v53  ;;  %v506_v55 = vld [vmem:[%s2670_s21 + $0x338] sm:$0xff]  ;;  %v508_v56 = vld [vmem:[%s2670_s21 + $0x340] sm:$0xff] }
  0x2d   : > { %505 = vst [vmem:[%s2675_s22 + $0x1b0] sm:$0xff] %v504_v54  ;;  %507 = vst [vmem:[%s2675_s22 + $0x1b8] sm:$0xff] %v506_v55  ;;  %v510_v57 = vld [vmem:[%s2670_s21 + $0x348] sm:$0xff]  ;;  %v512_v58 = vld [vmem:[%s2670_s21 + $0x350] sm:$0xff] }
  0x2e   : > { %509 = vst [vmem:[%s2675_s22 + $0x1c0] sm:$0xff] %v508_v56  ;;  %v514_v59 = vld [vmem:[%s2670_s21 + $0x358] sm:$0xff]  ;;  %511 = vst [vmem:[%s2675_s22 + $0x1c8] sm:$0xff] %v510_v57  ;;  %v516_v60 = vld [vmem:[%s2670_s21 + $0x360] sm:$0xff] }
  0x2f   : > { %513 = vst [vmem:[%s2675_s22 + $0x1d0] sm:$0xff] %v512_v58  ;;  %515 = vst [vmem:[%s2675_s22 + $0x1d8] sm:$0xff] %v514_v59  ;;  %v518_v61 = vld [vmem:[%s2670_s21 + $0x368] sm:$0xff]  ;;  %v520_v62 = vld [vmem:[%s2670_s21 + $0x370] sm:$0xff] }
  0x30   : > { %517 = vst [vmem:[%s2675_s22 + $0x1e0] sm:$0xff] %v516_v60  ;;  %519 = vst [vmem:[%s2675_s22 + $0x1e8] sm:$0xff] %v518_v61  ;;  %v522_v63 = vld [vmem:[%s2670_s21 + $0x378] sm:$0xff] }
  0x31   : > { %521 = vst [vmem:[%s2675_s22 + $0x1f0] sm:$0xff] %v520_v62  ;;  %523 = vst [vmem:[%s2675_s22 + $0x1f8] sm:$0xff] %v522_v63 }
  0x32 PF: > { %p2281_p5 = scmp.ge.s32.totalorder %s2556_s27, 1  ;;  %p528_p6 = scmp.lt.s32.totalorder %s2556_s27, 3 }
  0x34   : > { %p529_p7 = pnand %p2281_p5, %p528_p6 }
  0x35   : > { %s535_s23 = sand.u32 (!%p529_p7), 1, %s2548_s25   ;;  %s2283_s24 = sshll.u32 (!%p529_p7), %s2650_s28, 5 }
  0x36   : > { %532 = sbr.rel (%p529_p7) target bundleno = 1384 (0x568), region = 83  ;;  %s2282_s30 = sshll.u32 (!%p529_p7), %s535_s23, 9 }
  0x37   : > { %p580_p8 = scmp.lt.s32.totalorder (!%p529_p7), %s2283_s24, 63  ;;  %s2811_s19 = scalar_lea.vmem (!%p529_p7), [#allocation3], %s2282_s30 }
  0x38   : > { %p2285_p9 = scmp.ne.s32.totalorder (!%p529_p7), %s2650_s28, 0 }
  0x3d   : > { %s3116_s24 = smov (!%p580_p8, %s2283_s24), 63  ;;  %589 = sbr.rel (%p2285_p9) target bundleno = 1098 (0x44a), region = 91 }
  0x3e   : > { %s2284_s14 = sshll.u32 %s3116_s24, 3  ;;  %v590_v0 = vld [vmem:[%s3098_s0] sm:$0xff] (!%p2285_p9)  ;;  %vm606_vm0 = vcmask (!%p2285_p9), 1043456   ;;  %v592_v1 = vld [vmem:[%s3098_s0 + $0x10] sm:$0xff] (!%p2285_p9)  ;;  %v591_v2 = vld [vmem:[%s3098_s0 + $0x8] sm:$0xff] (!%p2285_p9)  ;;  %v2558_v21 = vmov (!%p2285_p9), 0.0   ;;  %v644_v26 = vlaneseq (!%p2285_p9) }
  0x3f   : > { %s2809_s18 = scalar_lea.vmem %s3111_s13, %s2284_s14  ;;  %v598_v3 = vcombine.high (!%p2285_p9), %v590_v0, %v590_v0  ;;  %v607_v4 = vsel (!%p2285_p9), %vm606_vm0, %v590_v0, 0.0  ;;  %v600_v5 = vcombine.high (!%p2285_p9), %v592_v1, %v592_v1  ;;  %v617_v6 = vsel (!%p2285_p9), %vm606_vm0, %v592_v1, 0.0  ;;  %v593_v7 = vld [vmem:[%s3098_s0 + $0x18] sm:$0xff] (!%p2285_p9)  ;;  %v632_v20 = vld [vmem:[%s3099_s1] sm:$0xf] (!%p2285_p9)  ;;  %2398 = vmatprep.subr.mxu0 (!%p2285_p9), %v2558_v21  ;;  %v746_v23 = vld [vmem:[%s3101_s3 + $0x8] sm:$0xff] (!%p2285_p9) }
  0x40   : > { %v599_v8 = vcombine.high (!%p2285_p9), %v591_v2, %v591_v2  ;;  %v601_v9 = vcombine.high (!%p2285_p9), %v593_v7, %v593_v7  ;;  %v612_v12 = vsel (!%p2285_p9), %vm606_vm0, %v591_v2, 0.0  ;;  %v622_v13 = vsel (!%p2285_p9), %vm606_vm0, %v593_v7, 0.0  ;;  %2399 = vmatpush3.msk.msra.mxu0 (!%p2285_p9), %vm606_vm0, %v632_v20  ;;  %v745_v22 = vld [vmem:[%s3101_s3] sm:$0xff] (!%p2285_p9)  ;;  %v832_v39 = vld [vmem:[%s3103_s5 + $0x8] sm:$0xff] (!%p2285_p9)  ;;  %v747_v48 = vld [vmem:[%s3101_s3 + $0x10] sm:$0xff] (!%p2285_p9)  ;;  %s2561_s24 = smov (!%p2285_p9), 96  }
  0x41   : > { %v608_v10 = vsel (!%p2285_p9), %vm606_vm0, %v598_v3, 0.0  ;;  %v618_v11 = vsel (!%p2285_p9), %vm606_vm0, %v600_v5, 0.0  ;;  %vm2559_vm1 = vmmov (!%p2285_p9), 0   ;;  %v2560_v24 = vmov (!%p2285_p9), 0.0|0.0   ;;  %v831_v38 = vld [vmem:[%s3103_s5] sm:$0xff] (!%p2285_p9)  ;;  %v748_v49 = vld [vmem:[%s3101_s3 + $0x18] sm:$0xff] (!%p2285_p9) }
  0x42   : > { %v609_v14 = vadd.f32 (!%p2285_p9), %v608_v10, %v607_v4  ;;  %v619_v15 = vadd.f32 (!%p2285_p9), %v618_v11, %v617_v6  ;;  %v613_v16 = vsel (!%p2285_p9), %vm606_vm0, %v599_v8, 0.0  ;;  %v623_v17 = vsel (!%p2285_p9), %vm606_vm0, %v601_v9, 0.0  ;;  %2400 = vmatprep.mubr.msk.f32.mxu0 (!%p2285_p9), %vm2559_vm1, %v2558_v21  ;;  %2411 = vmatprep.mubr.msk.f32.mxu1 (!%p2285_p9), %vm2559_vm1, %v2558_v21  ;;  %v833_v50 = vld [vmem:[%s3103_s5 + $0x10] sm:$0xff] (!%p2285_p9)  ;;  %v834_v52 = vld [vmem:[%s3103_s5 + $0x18] sm:$0xff] (!%p2285_p9)  ;;  %v2286_v54 = vld [vmem:[%s3100_s2] ss:$0 sm:$0xff] (!%p2285_p9) }
  0x43   : > { %v614_v18 = vadd.f32 (!%p2285_p9), %v613_v16, %v612_v12  ;;  %v624_v19 = vadd.f32 (!%p2285_p9), %v623_v17, %v622_v13  ;;  %2436 = vmatprep.subr.bf16.mxu1 (!%p2285_p9), %v2560_v24  ;;  %2442 = vmatprep.subr.bf16.mxu0 (!%p2285_p9), %v2560_v24  ;;  %v2437_v25 = vpack.c.bf16 (!%p2285_p9), %v746_v23, %v745_v22  ;;  %v645_v27 = vand.u32 (!%p2285_p9), 127, %v644_v26  ;;  %v945_v62 = vld [vmem:[%s3106_s8] sm:$0xff] (!%p2285_p9)  ;;  %v946_v63 = vld [vmem:[%s3106_s8 + $0x8] sm:$0xff] (!%p2285_p9)  ;;  %v947_v1 = vld [vmem:[%s3106_s8 + $0x10] sm:$0xff] (!%p2285_p9) }
  0x44   : > { %610 = vadd.xlane.f32.xlu0 %v609_v14  ;;  %620 = vadd.xlane.f32.xlu1 %v619_v15  ;;  %v647_v28 = vshrl.u32 %v644_v26, 7  ;;  %vm662_vm2 = vcmask 1041409   ;;  %vm664_vm3 = vcmask 1042434   ;;  %vm666_vm4 = vcmask 1043459   ;;  %v948_v2 = vld [vmem:[%s3106_s8 + $0x18] sm:$0xff] }
  0x45   : > { %2438 = vmatpush3.bf16.msra.mxu1 %v2437_v25  ;;  %vm668_vm5 = vcmask 31744   ;;  %v2443_v45 = vpack.c.bf16 %v832_v39, %v831_v38  ;;  %v2440_v51 = vpack.c.bf16 %v748_v49, %v747_v48  ;;  %v2446_v53 = vpack.c.bf16 %v834_v52, %v833_v50  ;;  %v2289_v4 = vld [vmem:[%s3102_s4] ss:$0 sm:$0xff] }
  0x46   : > { %2439 = vmatprep.subr.bf16.mxu1 %v2560_v24  ;;  %v648_v31 = vsub.s32 %v645_v27, %v647_v28  ;;  %vm756_vm6 = vcmask 261120   ;;  %vm1048_vm7 = vcmask 257026   ;;  %v2449_v0 = vpack.c.bf16 %v946_v63, %v945_v62 }
  0x47   : > { %v2452_v3 = vpack.c.bf16 %v948_v2, %v947_v1  ;;  %vm905_vm8 = vcmask 254976   ;;  %vm1066_vm13 = vcmask 1041408   ;;  %vm1071_vm14 = vcmask 257024  }
  0x48   : > { %615 = vadd.xlane.f32.xlu0 %v614_v18  ;;  %625 = vadd.xlane.f32.xlu1 %v624_v19 }
  0x49   : > { %2441 = vmatpush3.bf16.msra.mxu1 %v2440_v51 }
  0x4a   : > { %2448 = vmatprep.subr.bf16.mxu1 %v2560_v24 }
  0xd1   : > { %v611_v29 = vpop.xlane.xlu0 %610  ;;  %v621_v30 = vpop.xlane.xlu1 %620 }
  0xd2   : > { %v628_v32 = vmul.f32 0.00390625, %v611_v29  ;;  %v630_v33 = vmul.f32 0.00390625, %v621_v30  ;;  %v2292_v30 = vld [vmem:[%s3104_s6] ss:$0 sm:$0xff] }
  0xd4   : > { %v649_v40 = vrot.slane %v628_v32, %v648_v31  ;;  %v657_v43 = vrot.slane %v630_v33, %v648_v31  ;;  %v2293_v32 = vld [vmem:[%s3105_s7] ss:$0 sm:$0xff] }
  0xd5   : > { %v616_v34 = vpop.xlane.xlu0 %615  ;;  %v626_v35 = vpop.xlane.xlu1 %625 }
  0xd6   : > { %v629_v36 = vmul.f32 0.00390625, %v616_v34  ;;  %v631_v37 = vmul.f32 0.00390625, %v626_v35 }
  0xd8   : > { %v653_v41 = vrot.slane %v629_v36, %v648_v31  ;;  %v661_v42 = vrot.slane %v631_v37, %v648_v31 }
  0xda   : > { %v663_v44 = vsel %vm662_vm2, %v653_v41, %v649_v40  ;;  %v2294_v40 = vld [vmem:[%s3107_s9] ss:$0 sm:$0xff] }
  0xdb   : > { %v665_v46 = vsel %vm664_vm3, %v657_v43, %v663_v44 }
  0xdc   : > { %v667_v47 = vsel %vm666_vm4, %v661_v42, %v665_v46 }
  0xdd   : > { %2401 = vmatmul.mubr.msk.f32.vlgmr.msra.gmra.mrb[0].mxu0 %vm668_vm5, %v667_v47 }
  0xde   : > { %2444 = vmatpush3.bf16.msra.mxu0 %v2443_v45  ;;  %2422 = vmatprep.mubr.msk.f32.mxu0 %vm2559_vm1, %v2558_v21 }
  0xdf   : > { %2445 = vmatprep.subr.bf16.mxu0 %v2560_v24 }
  0xe2   : > { %2447 = vmatpush3.bf16.msra.mxu0 %v2446_v53 }
 0x1b0   : > { %v740_v55 = vpop.f32.mrb[0].mxu0 }
 0x1b1   : > { %v741_v56 = vadd.f32 %v2286_v54, %v740_v55  ;;  %v2402_v57 = vpop.f32.mrb[1].mxu0 }
 0x1b3   : > { %v2873_v58 = vmax.f32 %v741_v56, 0.0 }
 0x1b5   : > { %2412 = vmatmul.mubr.msk.f32.vlgmr.msra.gmra.mrb[0].mxu1 %vm756_vm6, %v2873_v58  ;;  %2423 = vmatmul.mubr.msk.f32.vlgmr.msra.gmra.mrb[2].mxu0 %vm756_vm6, %v2873_v58  ;;  %v1043_v59 = vmul.f32 %v2873_v58, %v2873_v58 }
 0x1b6   : > { %2433 = vmatprep.mubr.msk.f32.mxu1 %vm2559_vm1, %v2558_v21  ;;  %2450 = vmatpush3.bf16.msra.mxu1 %v2449_v0 }
 0x1b7   : > { %1045 = vrot.lane.b32.xlu0 %v1043_v59, %s2561_s24  ;;  %2451 = vmatprep.subr.bf16.mxu1 %v2560_v24 }
 0x1ba   : > { %2453 = vmatpush3.bf16.msra.mxu1 %v2452_v3 }
 0x229   : > { %v1046_v60 = vpop.permute.xlu0 %1045 }
 0x22a   : > { %v1049_v61 = vsel %vm1048_vm7, %v1046_v60, 0.0 }
 0x22b   : > { %1050 = vadd.xlane.f32.xlu1 %v1049_v61 }
 0x288   : > { %v826_v5 = vpop.f32.mrb[0].mxu1  ;;  %v901_v6 = vpop.f32.mrb[2].mxu0 }
 0x289   : > { %v827_v7 = vadd.f32 %v2289_v4, %v826_v5  ;;  %v906_v8 = vsel %vm905_vm8, %v901_v6, 0.0  ;;  %v2413_v9 = vpop.f32.mrb[1].mxu1  ;;  %v2424_v10 = vpop.f32.mrb[3].mxu0 }
 0x28a   : > { %v907_v11 = vrot.slane %v906_v8, 4 }
 0x28b   : > { %830 = vst [vmem:[#allocation4] sm:$0x3] %v827_v7 }
 0x28c   : > { %v908_v12 = vadd.f32 %v907_v11, %v906_v8 }
 0x28e   : > { %v909_v13 = vrot.slane %v908_v12, 2 }
 0x290   : > { %v910_v14 = vadd.f32 %v909_v13, %v908_v12 }
 0x292   : > { %v911_v15 = vrot.slane %v910_v14, 1 }
 0x294   : > { %v912_v16 = vadd.f32 %v911_v15, %v910_v14 }
 0x296   : > { %v914_v17 = vmul.f32 0.5, %v912_v16 }
 0x298   : > { %v915_v18 = vsub.f32 %v901_v6, %v914_v17 }
 0x29a   : > { %v916_v19 = vmul.f32 %v915_v18, %v915_v18 }
 0x29c   : > { %v917_v20 = vsel %vm905_vm8, %v916_v19, 0.0 }
 0x29d   : > { %v918_v21 = vrot.slane %v917_v20, 4 }
 0x29f   : > { %v919_v22 = vadd.f32 %v918_v21, %v917_v20 }
 0x2a1   : > { %v920_v23 = vrot.slane %v919_v22, 2 }
 0x2a3   : > { %v921_v24 = vadd.f32 %v920_v23, %v919_v22 }
 0x2a5   : > { %v922_v25 = vrot.slane %v921_v24, 1 }
 0x2a7   : > { %v923_v26 = vadd.f32 %v922_v25, %v921_v24 }
 0x2a9   : > { %v924_v27 = vmul.f32 0.5, %v923_v26 }
 0x2ab   : > { %v925_v28 = vadd.f32 1e-05, %v924_v27 }
 0x2ad   : > { %2494 = vrsqrt.f32 %v925_v28 }
 0x2b7   : > { %v2495_v29 = vpop.eup %2494 }
 0x2b8   : > { %v927_v31 = vmul.f32 %v2495_v29, %v915_v18  ;;  %v1051_v36 = vpop.xlane.xlu1 %1050 }
 0x2b9   : > { %2496 = vrsqrt.f32 %v1051_v36  ;;  %vm1054_vm9 = vcmp.eq.f32.partialorder %v1051_v36, inf  ;;  %v1057_v41 = vand.u32 2147483648, %v1051_v36  ;;  %vm1056_vm10 = vcmp.eq.f32.partialorder %v1051_v36, 0.0 }
 0x2ba   : > { %v935_v33 = vmul.f32 %v2292_v30, %v927_v31 }
 0x2bc   : > { %v943_v34 = vadd.f32 %v2293_v32, %v935_v33 }
 0x2be   : > { %v944_v35 = vmax.f32 %v943_v34, 0.0 }
 0x2c0   : > { %2434 = vmatmul.mubr.msk.f32.vlgmr.msra.gmra.mrb[2].mxu1 %vm756_vm6, %v944_v35 }
 0x2c3   : > { %v2497_v37 = vpop.eup %2496 }
 0x2c4   : > { %v1053_v38 = vmul.f32 %v2497_v37, %v1051_v36 }
 0x2c6   : > { %v1055_v39 = vsel %vm1054_vm9, %v1051_v36, %v1053_v38 }
 0x2c7   : > { %v1058_v43 = vsel %vm1056_vm10, %v1057_v41, %v1055_v39 }
 0x2c8   : > { %v1059_v47 = vmax.f32 %v1058_v43, 1e-12 }
 0x2ca   : > { %2498 = vrcp.f32 %v1059_v47 }
 0x2d4   : > { %v2499_v49 = vpop.eup %2498 }
 0x2d5   : > { %v1061_v50 = vmul.f32 %v2499_v49, %v2873_v58 }
 0x393   : > { %v1025_v42 = vpop.f32.mrb[2].mxu1 }
 0x394   : > { %v1026_v44 = vadd.f32 %v2294_v40, %v1025_v42  ;;  %v2435_v45 = vpop.f32.mrb[3].mxu1 }
 0x396   : > { %v1029_v46 = vmul.f32 %v1026_v44, %v1026_v44 }
 0x398   : > { %v1030_v48 = vsel %vm905_vm8, %v1029_v46, 0.0 }
 0x399   : > { %1031 = vadd.xlane.f32.xlu1 %v1030_v48 }
 0x3aa   : > { %1063 = vrot.lane.b32.xlu1 %v1061_v50, %s2561_s24 }
 0x426   : > { %v1032_v51 = vpop.xlane.xlu1 %1031 }
 0x427   : > { %2500 = vrsqrt.f32 %v1032_v51  ;;  %vm1035_vm11 = vcmp.eq.f32.partialorder %v1032_v51, inf  ;;  %v1038_v54 = vand.u32 2147483648, %v1032_v51  ;;  %vm1037_vm12 = vcmp.eq.f32.partialorder %v1032_v51, 0.0 }
 0x42a   : > { %v1064_v61 = vpop.permute.xlu1 %1063 }
 0x431   : > { %v2501_v52 = vpop.eup %2500 }
 0x432   : > { %v1034_v53 = vmul.f32 %v2501_v52, %v1032_v51 }
 0x434   : > { %v1036_v55 = vsel %vm1035_vm11, %v1032_v51, %v1034_v53 }
 0x435   : > { %v1039_v56 = vsel %vm1037_vm12, %v1038_v54, %v1036_v55 }
 0x436   : > { %v1040_v57 = vmax.f32 %v1039_v56, 1e-12 }
 0x438   : > { %2502 = vrcp.f32 %v1040_v57 }
 0x442   : > { %v2503_v59 = vpop.eup %2502 }
 0x443   : > { %v1042_v60 = vmul.f32 %v2503_v59, %v1026_v44 }
 0x445   : > { %v1067_v62 = vsel %vm1066_vm13, %v1042_v60, %v1064_v61 }
 0x446   : > { %v1068_v58 = vsel %vm606_vm0, %v1067_v62, 0.0 }
 0x447   : > { %1069 = vst.msk [vmem:[%s3110_s12] sm:$0xff] %vm756_vm6, %v1068_v58  ;;  %v1070_v63 = vpack.c.bf16 %v1068_v58, %v1068_v58 }
 0x449   : > { %1072 = vst.msk [vmem:[#allocation2] sm:$0xf] %vm1071_vm14, %v1070_v63 }
 0x44a PF: > { %v1074_v0 = vld [vmem:[%s2811_s19] sm:$0xff]  ;;  %v1075_v2 = vld [vmem:[%s2811_s19 + $0x8] sm:$0xff]  ;;  %v2562_v8 = vmov 0   ;;  %v1076_v15 = vld [vmem:[%s2811_s19 + $0x10] sm:$0xff]  ;;  %vm1458_vm15 = vcmask 261120   ;;  %p2458_p10 = scmp.eq.s32.totalorder %s2650_s28, 1 }
 0x44b   : > { %v1090_v1 = vld [vmem:[%s2811_s19 + $0x80] sm:$0xff]  ;;  %v1091_v4 = vld [vmem:[%s2811_s19 + $0x88] sm:$0xff]  ;;  %1494 = vmatprep.mubr.bf16.mxu0 %v2562_v8  ;;  %1535 = vmatprep.mubr.bf16.mxu1 %v2562_v8  ;;  %v1092_v16 = vld [vmem:[%s2811_s19 + $0x90] sm:$0xff] }
 0x44c   : > { %v2297_v3 = vcombine.high %v1074_v0, %v1090_v1  ;;  %v2296_v5 = vcombine.low %v1074_v0, %v1090_v1  ;;  %v1106_v6 = vld [vmem:[%s2811_s19 + $0x100] sm:$0xff]  ;;  %v2299_v9 = vcombine.high %v1075_v2, %v1091_v4  ;;  %v2298_v10 = vcombine.low %v1075_v2, %v1091_v4  ;;  %v1107_v12 = vld [vmem:[%s2811_s19 + $0x108] sm:$0xff]  ;;  %v1077_v17 = vld [vmem:[%s2811_s19 + $0x18] sm:$0xff] }
 0x44d   : > { %v1122_v7 = vld [vmem:[%s2811_s19 + $0x180] sm:$0xff]  ;;  %v1123_v13 = vld [vmem:[%s2811_s19 + $0x188] sm:$0xff]  ;;  %v1093_v19 = vld [vmem:[%s2811_s19 + $0x98] sm:$0xff]  ;;  %v2301_v21 = vcombine.high %v1076_v15, %v1092_v16  ;;  %v2300_v28 = vcombine.low %v1076_v15, %v1092_v16 }
 0x44e   : > { %v2329_v11 = vcombine.high %v1106_v6, %v1122_v7  ;;  %1462 = vmatprep.subr.bf16.mxu0 %v2297_v3  ;;  %v2331_v14 = vcombine.high %v1107_v12, %v1123_v13  ;;  %1503 = vmatprep.subr.bf16.mxu1 %v2299_v9  ;;  %v2328_v18 = vcombine.low %v1106_v6, %v1122_v7  ;;  %v1108_v23 = vld [vmem:[%s2811_s19 + $0x110] sm:$0xff]  ;;  %v1109_v25 = vld [vmem:[%s2811_s19 + $0x118] sm:$0xff]  ;;  %v1078_v32 = vld [vmem:[%s2811_s19 + $0x20] sm:$0xff] }
 0x44f   : > { %1463 = vmatpush1.bf16.msra.mxu0 %v2296_v5  ;;  %1504 = vmatpush1.bf16.msra.mxu1 %v2298_v10  ;;  %v2330_v20 = vcombine.low %v1107_v12, %v1123_v13  ;;  %v2303_v22 = vcombine.high %v1077_v17, %v1093_v19  ;;  %v1124_v24 = vld [vmem:[%s2811_s19 + $0x190] sm:$0xff]  ;;  %v1125_v26 = vld [vmem:[%s2811_s19 + $0x198] sm:$0xff]  ;;  %v2302_v29 = vcombine.low %v1077_v17, %v1093_v19  ;;  %v1094_v33 = vld [vmem:[%s2811_s19 + $0xa0] sm:$0xff] }
 0x450   : > { %1464 = vmatprep.subr.bf16.mxu0 %v2329_v11  ;;  %1505 = vmatprep.subr.bf16.mxu1 %v2331_v14  ;;  %v2937_v27 = vld [vmem:[#allocation2] sm:$0xf]  ;;  %v2333_v30 = vcombine.high %v1108_v23, %v1124_v24  ;;  %v2335_v31 = vcombine.high %v1109_v25, %v1125_v26  ;;  %v1079_v34 = vld [vmem:[%s2811_s19 + $0x28] sm:$0xff]  ;;  %v2332_v36 = vcombine.low %v1108_v23, %v1124_v24  ;;  %v1110_v40 = vld [vmem:[%s2811_s19 + $0x120] sm:$0xff] }
 0x451   : > { %v1095_v35 = vld [vmem:[%s2811_s19 + $0xa8] sm:$0xff]  ;;  %v2334_v37 = vcombine.low %v1109_v25, %v1125_v26  ;;  %v2305_v38 = vcombine.high %v1078_v32, %v1094_v33  ;;  %v1126_v41 = vld [vmem:[%s2811_s19 + $0x1a0] sm:$0xff]  ;;  %v2304_v44 = vcombine.low %v1078_v32, %v1094_v33  ;;  %v1080_v48 = vld [vmem:[%s2811_s19 + $0x30] sm:$0xff] }
 0x452   : > { %v2307_v39 = vcombine.high %v1079_v34, %v1095_v35  ;;  %v1111_v42 = vld [vmem:[%s2811_s19 + $0x128] sm:$0xff]  ;;  %v2306_v45 = vcombine.low %v1079_v34, %v1095_v35  ;;  %v2337_v46 = vcombine.high %v1110_v40, %v1126_v41  ;;  %v1096_v49 = vld [vmem:[%s2811_s19 + $0xb0] sm:$0xff]  ;;  %v1081_v50 = vld [vmem:[%s2811_s19 + $0x38] sm:$0xff]  ;;  %v2336_v52 = vcombine.low %v1110_v40, %v1126_v41 }
 0x453   : > { %1465 = vmatpush1.bf16.msra.mxu0 %v2328_v18  ;;  %1506 = vmatpush1.bf16.msra.mxu1 %v2330_v20  ;;  %v1127_v43 = vld [vmem:[%s2811_s19 + $0x1a8] sm:$0xff]  ;;  %v1097_v51 = vld [vmem:[%s2811_s19 + $0xb8] sm:$0xff]  ;;  %v2309_v54 = vcombine.high %v1080_v48, %v1096_v49  ;;  %v1112_v56 = vld [vmem:[%s2811_s19 + $0x130] sm:$0xff]  ;;  %v2308_v61 = vcombine.low %v1080_v48, %v1096_v49 }
 0x454   : > { %1544 = vmatprep.subr.bf16.mxu0 %v2301_v21  ;;  %1585 = vmatprep.subr.bf16.mxu1 %v2303_v22  ;;  %v2339_v47 = vcombine.high %v1111_v42, %v1127_v43  ;;  %v2338_v53 = vcombine.low %v1111_v42, %v1127_v43  ;;  %v2311_v55 = vcombine.high %v1081_v50, %v1097_v51  ;;  %v1128_v57 = vld [vmem:[%s2811_s19 + $0x1b0] sm:$0xff]  ;;  %v1113_v59 = vld [vmem:[%s2811_s19 + $0x138] sm:$0xff]  ;;  %v1082_v0 = vld [vmem:[%s2811_s19 + $0x40] sm:$0xff] }
 0x455   : > { %v1129_v60 = vld [vmem:[%s2811_s19 + $0x1b8] sm:$0xff]  ;;  %v2310_v62 = vcombine.low %v1081_v50, %v1097_v51  ;;  %v2341_v58 = vcombine.high %v1112_v56, %v1128_v57  ;;  %v1098_v1 = vld [vmem:[%s2811_s19 + $0xc0] sm:$0xff]  ;;  %v1083_v2 = vld [vmem:[%s2811_s19 + $0x48] sm:$0xff]  ;;  %v2340_v4 = vcombine.low %v1112_v56, %v1128_v57 }
 0x456   : > { %2360 = vmatmul.mubr.msk.bf16.vlgmr.msra.gmra.mrb[0].mxu0 %vm1458_vm15, %v2937_v27  ;;  %2361 = vmatmul.mubr.msk.bf16.vlgmr.msra.gmra.mrb[0].mxu1 %vm1458_vm15, %v2937_v27  ;;  %v2343_v63 = vcombine.high %v1113_v59, %v1129_v60  ;;  %v1099_v3 = vld [vmem:[%s2811_s19 + $0xc8] sm:$0xff]  ;;  %v2342_v5 = vcombine.low %v1113_v59, %v1129_v60  ;;  %v2313_v6 = vcombine.high %v1082_v0, %v1098_v1  ;;  %v1114_v9 = vld [vmem:[%s2811_s19 + $0x140] sm:$0xff]  ;;  %v1084_v17 = vld [vmem:[%s2811_s19 + $0x50] sm:$0xff] }
 0x457   : > { %1545 = vmatpush1.bf16.msra.mxu0 %v2300_v28  ;;  %1586 = vmatpush1.bf16.msra.mxu1 %v2302_v29  ;;  %v2315_v7 = vcombine.high %v1083_v2, %v1099_v3  ;;  %v1130_v10 = vld [vmem:[%s2811_s19 + $0x1c0] sm:$0xff]  ;;  %v1115_v11 = vld [vmem:[%s2811_s19 + $0x148] sm:$0xff]  ;;  %v2312_v13 = vcombine.low %v1082_v0, %v1098_v1  ;;  %v2314_v14 = vcombine.low %v1083_v2, %v1099_v3  ;;  %v1100_v18 = vld [vmem:[%s2811_s19 + $0xd0] sm:$0xff] }
 0x458   : > { %1546 = vmatprep.subr.bf16.mxu0 %v2333_v30  ;;  %1587 = vmatprep.subr.bf16.mxu1 %v2335_v31  ;;  %v1131_v12 = vld [vmem:[%s2811_s19 + $0x1c8] sm:$0xff]  ;;  %v2345_v15 = vcombine.high %v1114_v9, %v1130_v10  ;;  %v1085_v19 = vld [vmem:[%s2811_s19 + $0x58] sm:$0xff]  ;;  %v2344_v21 = vcombine.low %v1114_v9, %v1130_v10  ;;  %v2317_v23 = vcombine.high %v1084_v17, %v1100_v18  ;;  %v1116_v25 = vld [vmem:[%s2811_s19 + $0x150] sm:$0xff] }
 0x459   : > { %1576 = vmatprep.mubr.bf16.mxu0 %v2562_v8  ;;  %1617 = vmatprep.mubr.bf16.mxu1 %v2562_v8  ;;  %v2347_v16 = vcombine.high %v1115_v11, %v1131_v12  ;;  %v1101_v20 = vld [vmem:[%s2811_s19 + $0xd8] sm:$0xff]  ;;  %v2346_v22 = vcombine.low %v1115_v11, %v1131_v12  ;;  %v1132_v26 = vld [vmem:[%s2811_s19 + $0x1d0] sm:$0xff]  ;;  %v2316_v30 = vcombine.low %v1084_v17, %v1100_v18  ;;  %v1086_v34 = vld [vmem:[%s2811_s19 + $0x60] sm:$0xff] }
 0x45a   : > { %v2319_v24 = vcombine.high %v1085_v19, %v1101_v20  ;;  %v1117_v28 = vld [vmem:[%s2811_s19 + $0x158] sm:$0xff]  ;;  %v2318_v31 = vcombine.low %v1085_v19, %v1101_v20  ;;  %v2349_v32 = vcombine.high %v1116_v25, %v1132_v26  ;;  %v1102_v35 = vld [vmem:[%s2811_s19 + $0xe0] sm:$0xff]  ;;  %v1088_v50 = vld [vmem:[%s2811_s19 + $0x70] sm:$0xff] }
 0x45b   : > { %1547 = vmatpush1.bf16.msra.mxu0 %v2332_v36  ;;  %1588 = vmatpush1.bf16.msra.mxu1 %v2334_v37  ;;  %v1133_v29 = vld [vmem:[%s2811_s19 + $0x1d8] sm:$0xff]  ;;  %v1087_v36 = vld [vmem:[%s2811_s19 + $0x68] sm:$0xff]  ;;  %v2321_v40 = vcombine.high %v1086_v34, %v1102_v35  ;;  %v1118_v42 = vld [vmem:[%s2811_s19 + $0x160] sm:$0xff] }
 0x45c   : > { %1626 = vmatprep.subr.bf16.mxu0 %v2305_v38  ;;  %1667 = vmatprep.subr.bf16.mxu1 %v2307_v39  ;;  %v2351_v33 = vcombine.high %v1117_v28, %v1133_v29  ;;  %v1103_v37 = vld [vmem:[%s2811_s19 + $0xe8] sm:$0xff]  ;;  %v2348_v38 = vcombine.low %v1116_v25, %v1132_v26  ;;  %v2350_v39 = vcombine.low %v1117_v28, %v1133_v29  ;;  %v1134_v43 = vld [vmem:[%s2811_s19 + $0x1e0] sm:$0xff]  ;;  %v1104_v51 = vld [vmem:[%s2811_s19 + $0xf0] sm:$0xff] }
 0x45d   : > { %v2323_v41 = vcombine.high %v1087_v36, %v1103_v37  ;;  %v2353_v48 = vcombine.high %v1118_v42, %v1134_v43  ;;  %v2325_v56 = vcombine.high %v1088_v50, %v1104_v51  ;;  %v1120_v59 = vld [vmem:[%s2811_s19 + $0x170] sm:$0xff] }
 0x45e   : > { %2362 = vmatmul.mubr.msk.bf16.vlgmr.msra.gmra.mrb[4].mxu0 %vm1458_vm15, %v2937_v27  ;;  %2363 = vmatmul.mubr.msk.bf16.vlgmr.msra.gmra.mrb[4].mxu1 %vm1458_vm15, %v2937_v27  ;;  %v1136_v60 = vld [vmem:[%s2811_s19 + $0x1f0] sm:$0xff] }
 0x45f   : > { %1627 = vmatpush1.bf16.msra.mxu0 %v2304_v44  ;;  %1668 = vmatpush1.bf16.msra.mxu1 %v2306_v45  ;;  %v1119_v44 = vld [vmem:[%s2811_s19 + $0x168] sm:$0xff]  ;;  %v2357_v0 = vcombine.high %v1120_v59, %v1136_v60  ;;  %v2356_v2 = vcombine.low %v1120_v59, %v1136_v60 }
 0x460   : > { %1628 = vmatprep.subr.bf16.mxu0 %v2337_v46  ;;  %1669 = vmatprep.subr.bf16.mxu1 %v2339_v47  ;;  %v1135_v45 = vld [vmem:[%s2811_s19 + $0x1e8] sm:$0xff]  ;;  %v2320_v46 = vcombine.low %v1086_v34, %v1102_v35  ;;  %v2322_v47 = vcombine.low %v1087_v36, %v1103_v37 }
 0x461   : > { %1658 = vmatprep.mubr.bf16.mxu0 %v2562_v8  ;;  %1699 = vmatprep.mubr.bf16.mxu1 %v2562_v8  ;;  %v2355_v49 = vcombine.high %v1119_v44, %v1135_v45 }
 0x463   : > { %1629 = vmatpush1.bf16.msra.mxu0 %v2336_v52  ;;  %1670 = vmatpush1.bf16.msra.mxu1 %v2338_v53  ;;  %v1089_v52 = vld [vmem:[%s2811_s19 + $0x78] sm:$0xff] }
 0x464   : > { %1708 = vmatprep.subr.bf16.mxu0 %v2309_v54  ;;  %1749 = vmatprep.subr.bf16.mxu1 %v2311_v55  ;;  %v1105_v53 = vld [vmem:[%s2811_s19 + $0xf8] sm:$0xff]  ;;  %v2352_v54 = vcombine.low %v1118_v42, %v1134_v43  ;;  %v2354_v55 = vcombine.low %v1119_v44, %v1135_v45 }
 0x465   : > { %v2327_v57 = vcombine.high %v1089_v52, %v1105_v53 }
 0x466   : > { %2364 = vmatmul.mubr.msk.bf16.vlgmr.msra.gmra.mrb[8].mxu0 %vm1458_vm15, %v2937_v27  ;;  %2365 = vmatmul.mubr.msk.bf16.vlgmr.msra.gmra.mrb[8].mxu1 %vm1458_vm15, %v2937_v27 }
 0x467   : > { %1709 = vmatpush1.bf16.msra.mxu0 %v2308_v61  ;;  %1750 = vmatpush1.bf16.msra.mxu1 %v2310_v62  ;;  %v1121_v61 = vld [vmem:[%s2811_s19 + $0x178] sm:$0xff] }
 0x468   : > { %1710 = vmatprep.subr.bf16.mxu0 %v2341_v58  ;;  %1751 = vmatprep.subr.bf16.mxu1 %v2343_v63  ;;  %v1137_v62 = vld [vmem:[%s2811_s19 + $0x1f8] sm:$0xff]  ;;  %v2324_v58 = vcombine.low %v1088_v50, %v1104_v51  ;;  %v2326_v63 = vcombine.low %v1089_v52, %v1105_v53  ;;  %s2563_s19 = smov [#allocation4]  }
 0x469   : > { %1740 = vmatprep.mubr.bf16.mxu0 %v2562_v8  ;;  %1781 = vmatprep.mubr.bf16.mxu1 %v2562_v8  ;;  %v2359_v1 = vcombine.high %v1121_v61, %v1137_v62  ;;  %v2358_v3 = vcombine.low %v1121_v61, %v1137_v62  ;;  %s2194_s21 = sshll.u32 %s2563_s19, 4  ;;  %s2195_s21 = int_to_ptr.vmem [resolvable:$true] %s2194_s21 }
 0x46a   : > { %s2504_s22 = scalar_lea.vmem %s2195_s21, 32  ;;  %p2511_p0 = scmp.lt.s32.totalorder %s2195_s21, %s2195_s21 }
 0x46b   : > { %1711 = vmatpush1.bf16.msra.mxu0 %v2340_v4  ;;  %1752 = vmatpush1.bf16.msra.mxu1 %v2342_v5  ;;  %p2505_p11 = scmp.ne.s32.totalorder %s2195_s21, %s2504_s22  ;;  %p2512_p1 = scmp.lt.s32.totalorder %s2504_s22, %s2504_s22 }
 0x46c   : > { %1790 = vmatprep.subr.bf16.mxu0 %v2313_v6  ;;  %1831 = vmatprep.subr.bf16.mxu1 %v2315_v7 }
 0x46d   : > { %p2506_p12 = pnand %p2505_p11, %p2458_p10  ;;  %p2513_p2 = por %p2512_p1, %p2511_p0 }
 0x46e   : > { %2366 = vmatmul.mubr.msk.bf16.vlgmr.msra.gmra.mrb[12].mxu0 %vm1458_vm15, %v2937_v27  ;;  %2367 = vmatmul.mubr.msk.bf16.vlgmr.msra.gmra.mrb[12].mxu1 %vm1458_vm15, %v2937_v27 }
 0x46f   : > { %1791 = vmatpush1.bf16.msra.mxu0 %v2312_v13  ;;  %1832 = vmatpush1.bf16.msra.mxu1 %v2314_v14  ;;  %p2507_p13 = pneg %p2506_p12 }
 0x470   : > { %1792 = vmatprep.subr.bf16.mxu0 %v2345_v15  ;;  %1833 = vmatprep.subr.bf16.mxu1 %v2347_v16 }
 0x471   : > { %1822 = vmatprep.mubr.bf16.mxu0 %v2562_v8  ;;  %1863 = vmatprep.mubr.bf16.mxu1 %v2562_v8  ;;  %p2514_p3 = pnand %p2513_p2, %p2507_p13 }
 0x473   : > { %1793 = vmatpush1.bf16.msra.mxu0 %v2344_v21  ;;  %1834 = vmatpush1.bf16.msra.mxu1 %v2346_v22 }
 0x474   : > { %1872 = vmatprep.subr.bf16.mxu0 %v2317_v23  ;;  %1913 = vmatprep.subr.bf16.mxu1 %v2319_v24 }
 0x476   : > { %2368 = vmatmul.mubr.msk.bf16.vlgmr.msra.gmra.mrb[16].mxu0 %vm1458_vm15, %v2937_v27  ;;  %2369 = vmatmul.mubr.msk.bf16.vlgmr.msra.gmra.mrb[16].mxu1 %vm1458_vm15, %v2937_v27 }
 0x477   : > { %1873 = vmatpush1.bf16.msra.mxu0 %v2316_v30  ;;  %1914 = vmatpush1.bf16.msra.mxu1 %v2318_v31 }
 0x478   : > { %1874 = vmatprep.subr.bf16.mxu0 %v2349_v32  ;;  %1915 = vmatprep.subr.bf16.mxu1 %v2351_v33 }
 0x479   : > { %1904 = vmatprep.mubr.bf16.mxu0 %v2562_v8  ;;  %1945 = vmatprep.mubr.bf16.mxu1 %v2562_v8 }
 0x47b   : > { %1875 = vmatpush1.bf16.msra.mxu0 %v2348_v38  ;;  %1916 = vmatpush1.bf16.msra.mxu1 %v2350_v39 }
 0x47c   : > { %1954 = vmatprep.subr.bf16.mxu0 %v2321_v40  ;;  %1995 = vmatprep.subr.bf16.mxu1 %v2323_v41 }
 0x47e   : > { %2370 = vmatmul.mubr.msk.bf16.vlgmr.msra.gmra.mrb[20].mxu0 %vm1458_vm15, %v2937_v27  ;;  %2371 = vmatmul.mubr.msk.bf16.vlgmr.msra.gmra.mrb[20].mxu1 %vm1458_vm15, %v2937_v27 }
 0x47f   : > { %1955 = vmatpush1.bf16.msra.mxu0 %v2320_v46  ;;  %1996 = vmatpush1.bf16.msra.mxu1 %v2322_v47 }
 0x480   : > { %1956 = vmatprep.subr.bf16.mxu0 %v2353_v48  ;;  %1997 = vmatprep.subr.bf16.mxu1 %v2355_v49 }
 0x481   : > { %1986 = vmatprep.mubr.bf16.mxu0 %v2562_v8  ;;  %2027 = vmatprep.mubr.bf16.mxu1 %v2562_v8 }
 0x483   : > { %1957 = vmatpush1.bf16.msra.mxu0 %v2352_v54  ;;  %1998 = vmatpush1.bf16.msra.mxu1 %v2354_v55 }
 0x484   : > { %2036 = vmatprep.subr.bf16.mxu0 %v2325_v56  ;;  %2077 = vmatprep.subr.bf16.mxu1 %v2327_v57 }
 0x486   : > { %2372 = vmatmul.mubr.msk.bf16.vlgmr.msra.gmra.mrb[24].mxu0 %vm1458_vm15, %v2937_v27  ;;  %2373 = vmatmul.mubr.msk.bf16.vlgmr.msra.gmra.mrb[24].mxu1 %vm1458_vm15, %v2937_v27 }
 0x487   : > { %2037 = vmatpush1.bf16.msra.mxu0 %v2324_v58  ;;  %2078 = vmatpush1.bf16.msra.mxu1 %v2326_v63 }
 0x488   : > { %2038 = vmatprep.subr.bf16.mxu0 %v2357_v0  ;;  %2079 = vmatprep.subr.bf16.mxu1 %v2359_v1 }
 0x489   : > { %2068 = vmatprep.mubr.bf16.mxu0 %v2562_v8  ;;  %2109 = vmatprep.mubr.bf16.mxu1 %v2562_v8 }
 0x48b   : > { %2039 = vmatpush1.bf16.msra.mxu0 %v2356_v2  ;;  %2080 = vmatpush1.bf16.msra.mxu1 %v2358_v3 }
 0x48e   : > { %2374 = vmatmul.mubr.msk.bf16.vlgmr.msra.gmra.mrb[28].mxu0 %vm1458_vm15, %v2937_v27  ;;  %2375 = vmatmul.mubr.msk.bf16.vlgmr.msra.gmra.mrb[28].mxu1 %vm1458_vm15, %v2937_v27 }
 0x48f   : > { %2517 = shalt.err (!%p2514_p3)
}
 0x490   : > { %s2518_s14 = scalar_lea.hbm %s3109_s11, 32 }
 0x491   : > { %p2519_p4 = scmp.ne.s32.totalorder %s3109_s11, %s2518_s14  ;;  %p2524_p7 = scmp.lt.u32.totalorder %s2518_s14, %s3109_s11 }
 0x493   : > { %p2520_p5 = pnand %p2519_p4, %p2458_p10 }
 0x495   : > { %p2521_p6 = pneg %p2520_p5 }
 0x497   : > { %p2526_p8 = pnand %p2524_p7, %p2521_p6 }
 0x499   : > { %2529 = shalt.err (!%p2526_p8)
}
 0x49a   : > { %2455 = dma.vmem_to_hbm [thread:$0]  (%p2458_p10), %s2195_s21, 32, %s3109_s11, [#allocation5]  }
 0x529   : > { %v1496_v8 = vpop.f32.mrb[0].mxu0  ;;  %v1537_v4 = vpop.f32.mrb[0].mxu1 }
 0x52a   : > { %v2118_v27 = vmul.f32 14.285714, %v1496_v8  ;;  %v1498_v5 = vpop.f32.mrb[1].mxu0  ;;  %v2120_v6 = vmul.f32 14.285714, %v1537_v4  ;;  %v1539_v9 = vpop.f32.mrb[1].mxu1 }
 0x52b   : > { %v2119_v7 = vmul.f32 14.285714, %v1498_v5  ;;  %v1500_v10 = vpop.f32.mrb[2].mxu0  ;;  %v2121_v11 = vmul.f32 14.285714, %v1539_v9  ;;  %v1541_v12 = vpop.f32.mrb[2].mxu1 }
 0x52c   : > { %2150 = vst [vmem:[%s2809_s18] sm:$0xff] %v2118_v27  ;;  %v1501_v13 = vpop.f32.mrb[3].mxu0  ;;  %2152 = vst [vmem:[%s2809_s18 + $0x10] sm:$0xff] %v2120_v6  ;;  %v1542_v14 = vpop.f32.mrb[3].mxu1 }
 0x52d   : > { %2151 = vst [vmem:[%s2809_s18 + $0x8] sm:$0xff] %v2119_v7  ;;  %2153 = vst [vmem:[%s2809_s18 + $0x18] sm:$0xff] %v2121_v11 }
 0x531   : > { %v1578_v15 = vpop.f32.mrb[4].mxu0  ;;  %v1619_v17 = vpop.f32.mrb[4].mxu1 }
 0x532   : > { %v2122_v16 = vmul.f32 14.285714, %v1578_v15  ;;  %v1580_v18 = vpop.f32.mrb[5].mxu0  ;;  %v2124_v19 = vmul.f32 14.285714, %v1619_v17  ;;  %v1621_v21 = vpop.f32.mrb[5].mxu1 }
 0x533   : > { %v2123_v20 = vmul.f32 14.285714, %v1580_v18  ;;  %v1582_v22 = vpop.f32.mrb[6].mxu0  ;;  %v2125_v23 = vmul.f32 14.285714, %v1621_v21  ;;  %v1623_v24 = vpop.f32.mrb[6].mxu1 }
 0x534   : > { %2154 = vst [vmem:[%s2809_s18 + $0x20] sm:$0xff] %v2122_v16  ;;  %v1583_v25 = vpop.f32.mrb[7].mxu0  ;;  %2156 = vst [vmem:[%s2809_s18 + $0x30] sm:$0xff] %v2124_v19  ;;  %v1624_v26 = vpop.f32.mrb[7].mxu1 }
 0x535   : > { %2155 = vst [vmem:[%s2809_s18 + $0x28] sm:$0xff] %v2123_v20  ;;  %2157 = vst [vmem:[%s2809_s18 + $0x38] sm:$0xff] %v2125_v23 }
 0x539   : > { %v1660_v28 = vpop.f32.mrb[8].mxu0  ;;  %v1701_v30 = vpop.f32.mrb[8].mxu1 }
 0x53a   : > { %v2126_v29 = vmul.f32 14.285714, %v1660_v28  ;;  %v1662_v31 = vpop.f32.mrb[9].mxu0  ;;  %v2128_v32 = vmul.f32 14.285714, %v1701_v30  ;;  %v1703_v34 = vpop.f32.mrb[9].mxu1 }
 0x53b   : > { %v2127_v33 = vmul.f32 14.285714, %v1662_v31  ;;  %v1664_v35 = vpop.f32.mrb[10].mxu0  ;;  %v2129_v36 = vmul.f32 14.285714, %v1703_v34  ;;  %v1705_v37 = vpop.f32.mrb[10].mxu1 }
 0x53c   : > { %2158 = vst [vmem:[%s2809_s18 + $0x40] sm:$0xff] %v2126_v29  ;;  %v1665_v38 = vpop.f32.mrb[11].mxu0  ;;  %2160 = vst [vmem:[%s2809_s18 + $0x50] sm:$0xff] %v2128_v32  ;;  %v1706_v39 = vpop.f32.mrb[11].mxu1 }
 0x53d   : > { %2159 = vst [vmem:[%s2809_s18 + $0x48] sm:$0xff] %v2127_v33  ;;  %2161 = vst [vmem:[%s2809_s18 + $0x58] sm:$0xff] %v2129_v36 }
 0x541   : > { %v1742_v40 = vpop.f32.mrb[12].mxu0  ;;  %v1783_v42 = vpop.f32.mrb[12].mxu1 }
 0x542   : > { %v2130_v41 = vmul.f32 14.285714, %v1742_v40  ;;  %v1744_v43 = vpop.f32.mrb[13].mxu0  ;;  %v2132_v44 = vmul.f32 14.285714, %v1783_v42  ;;  %v1785_v46 = vpop.f32.mrb[13].mxu1 }
 0x543   : > { %v2131_v45 = vmul.f32 14.285714, %v1744_v43  ;;  %v1746_v47 = vpop.f32.mrb[14].mxu0  ;;  %v2133_v48 = vmul.f32 14.285714, %v1785_v46  ;;  %v1787_v49 = vpop.f32.mrb[14].mxu1 }
 0x544   : > { %2162 = vst [vmem:[%s2809_s18 + $0x60] sm:$0xff] %v2130_v41  ;;  %v1747_v50 = vpop.f32.mrb[15].mxu0  ;;  %2164 = vst [vmem:[%s2809_s18 + $0x70] sm:$0xff] %v2132_v44  ;;  %v1788_v51 = vpop.f32.mrb[15].mxu1 }
 0x545   : > { %2163 = vst [vmem:[%s2809_s18 + $0x68] sm:$0xff] %v2131_v45  ;;  %2165 = vst [vmem:[%s2809_s18 + $0x78] sm:$0xff] %v2133_v48 }
 0x549   : > { %v1824_v52 = vpop.f32.mrb[16].mxu0  ;;  %v1865_v54 = vpop.f32.mrb[16].mxu1 }
 0x54a   : > { %v2134_v53 = vmul.f32 14.285714, %v1824_v52  ;;  %v1826_v55 = vpop.f32.mrb[17].mxu0  ;;  %v2136_v56 = vmul.f32 14.285714, %v1865_v54  ;;  %v1867_v59 = vpop.f32.mrb[17].mxu1 }
 0x54b   : > { %v2135_v57 = vmul.f32 14.285714, %v1826_v55  ;;  %v1828_v60 = vpop.f32.mrb[18].mxu0  ;;  %v2137_v61 = vmul.f32 14.285714, %v1867_v59  ;;  %v1869_v62 = vpop.f32.mrb[18].mxu1 }
 0x54c   : > { %2166 = vst [vmem:[%s2809_s18 + $0x80] sm:$0xff] %v2134_v53  ;;  %v1829_v58 = vpop.f32.mrb[19].mxu0  ;;  %2168 = vst [vmem:[%s2809_s18 + $0x90] sm:$0xff] %v2136_v56  ;;  %v1870_v63 = vpop.f32.mrb[19].mxu1 }
 0x54d   : > { %2167 = vst [vmem:[%s2809_s18 + $0x88] sm:$0xff] %v2135_v57  ;;  %2169 = vst [vmem:[%s2809_s18 + $0x98] sm:$0xff] %v2137_v61 }
 0x551   : > { %v1906_v0 = vpop.f32.mrb[20].mxu0  ;;  %v1947_v2 = vpop.f32.mrb[20].mxu1 }
 0x552   : > { %v2138_v1 = vmul.f32 14.285714, %v1906_v0  ;;  %v1908_v3 = vpop.f32.mrb[21].mxu0  ;;  %v2140_v8 = vmul.f32 14.285714, %v1947_v2  ;;  %v1949_v4 = vpop.f32.mrb[21].mxu1 }
 0x553   : > { %v2139_v27 = vmul.f32 14.285714, %v1908_v3  ;;  %v1910_v5 = vpop.f32.mrb[22].mxu0  ;;  %v2141_v6 = vmul.f32 14.285714, %v1949_v4  ;;  %v1951_v7 = vpop.f32.mrb[22].mxu1 }
 0x554   : > { %2170 = vst [vmem:[%s2809_s18 + $0xa0] sm:$0xff] %v2138_v1  ;;  %v1911_v9 = vpop.f32.mrb[23].mxu0  ;;  %2172 = vst [vmem:[%s2809_s18 + $0xb0] sm:$0xff] %v2140_v8  ;;  %v1952_v10 = vpop.f32.mrb[23].mxu1 }
 0x555   : > { %2171 = vst [vmem:[%s2809_s18 + $0xa8] sm:$0xff] %v2139_v27  ;;  %2173 = vst [vmem:[%s2809_s18 + $0xb8] sm:$0xff] %v2141_v6 }
 0x559   : > { %v1988_v11 = vpop.f32.mrb[24].mxu0  ;;  %v2029_v13 = vpop.f32.mrb[24].mxu1 }
 0x55a   : > { %v2142_v12 = vmul.f32 14.285714, %v1988_v11  ;;  %v1990_v14 = vpop.f32.mrb[25].mxu0  ;;  %v2144_v15 = vmul.f32 14.285714, %v2029_v13  ;;  %v2031_v17 = vpop.f32.mrb[25].mxu1 }
 0x55b   : > { %v2143_v16 = vmul.f32 14.285714, %v1990_v14  ;;  %v1992_v18 = vpop.f32.mrb[26].mxu0  ;;  %v2145_v19 = vmul.f32 14.285714, %v2031_v17  ;;  %v2033_v20 = vpop.f32.mrb[26].mxu1 }
 0x55c   : > { %2174 = vst [vmem:[%s2809_s18 + $0xc0] sm:$0xff] %v2142_v12  ;;  %v1993_v21 = vpop.f32.mrb[27].mxu0  ;;  %2176 = vst [vmem:[%s2809_s18 + $0xd0] sm:$0xff] %v2144_v15  ;;  %v2034_v22 = vpop.f32.mrb[27].mxu1 }
 0x55d   : > { %2175 = vst [vmem:[%s2809_s18 + $0xc8] sm:$0xff] %v2143_v16  ;;  %2177 = vst [vmem:[%s2809_s18 + $0xd8] sm:$0xff] %v2145_v19 }
 0x561   : > { %v2070_v23 = vpop.f32.mrb[28].mxu0  ;;  %v2111_v25 = vpop.f32.mrb[28].mxu1 }
 0x562   : > { %v2146_v24 = vmul.f32 14.285714, %v2070_v23  ;;  %v2072_v26 = vpop.f32.mrb[29].mxu0  ;;  %v2148_v28 = vmul.f32 14.285714, %v2111_v25  ;;  %v2113_v30 = vpop.f32.mrb[29].mxu1 }
 0x563   : > { %v2147_v29 = vmul.f32 14.285714, %v2072_v26  ;;  %v2074_v31 = vpop.f32.mrb[30].mxu0  ;;  %v2149_v32 = vmul.f32 14.285714, %v2113_v30  ;;  %v2115_v33 = vpop.f32.mrb[30].mxu1 }
 0x564   : > { %2178 = vst [vmem:[%s2809_s18 + $0xe0] sm:$0xff] %v2146_v24  ;;  %v2075_v34 = vpop.f32.mrb[31].mxu0  ;;  %2180 = vst [vmem:[%s2809_s18 + $0xf0] sm:$0xff] %v2148_v28  ;;  %v2116_v35 = vpop.f32.mrb[31].mxu1 }
 0x565   : > { %2179 = vst [vmem:[%s2809_s18 + $0xe8] sm:$0xff] %v2147_v29  ;;  %2181 = vst [vmem:[%s2809_s18 + $0xf8] sm:$0xff] %v2149_v32 }
 0x566   : > { %2543 = dma.done.wait (%p2458_p10), [#allocation5], 32  }
 0x567   : > { %2545 = vsyncadd (%p2458_p10), [#allocation5], 4294967264 }
 0x568 PF: > { %p22_p9 = scmp.ge.s32.totalorder %s2653_s29, 4   ;;  %s3112_s25 = smov %s2552_s26 }
 0x569   : > { %s3113_s26 = smov %s2662_s15  ;;  %s3114_s27 = smov %s2653_s29 }
 0x56a   :  { %24 = sbr.rel (!%p22_p9) target bundleno = 2 (0x2), region = 143 }
 0x571   :  { %2225 = vsyncpa [#allocation5], 1 }
 0x572   :  { %2227 = vsyncpa [#allocation5 + $0x1], 1 }

</bundles_post_ra>
